<compile_context>
chip_gen: v6e
topology: v6e:2x2x1
jax: 0.10.0
libtpu: 0.0.40
codegen_flags: <defaults>
</compile_context>

<pallas_src>
import jax
import jax.numpy as jnp
from jax import lax
from jax.experimental import pallas as pl
from jax.experimental.pallas import tpu as pltpu

NEG_SLOPE = 0.1      # Layer.ACTIVATION_KWARGS['negative_slope']
BN_EPS = 1e-5        # PyTorch BatchNorm2d default eps

LANE = 128           # lane width: pad C_out to a multiple of this
TM = 512             # row tile (output pixels) for both kernels
TK = 128             # K (reduction) tile for the im2col matmul

# Set to jnp.bfloat16 on v6e / v7x for ~2x MXU throughput and half the patch
# DMA traffic (keep preferred_element_type=f32).  The demo keeps f32 so the
# correctness check against the pure-JAX reference stays tight.
MATMUL_DTYPE = jnp.float32


# ---------------- Pallas kernels ----------------

def _conv_act_stats_kernel(p_ref, w_ref, o_ref, sum_ref, sq_ref):
    """im2col matmul accumulated into o_ref; LeakyReLU + fused BN sum/sumsq epilogue."""
    k = pl.program_id(1)

    @pl.when(k == 0)
    def _():
        o_ref[...] = jnp.zeros_like(o_ref)

    o_ref[...] += jnp.dot(p_ref[...], w_ref[...],
                          preferred_element_type=jnp.float32)

    @pl.when(k == pl.num_programs(1) - 1)
    def _():
        acc = o_ref[...]
        act = jnp.where(acc >= 0, acc, NEG_SLOPE * acc)
        o_ref[...] = act
        # per-(row-tile) partial BN statistics; combined in the wrapper
        sum_ref[...] = jnp.sum(act, axis=0, keepdims=True)[None]
        sq_ref[...] = jnp.sum(act * act, axis=0, keepdims=True)[None]


def _bn_apply_kernel(x_ref, scale_ref, shift_ref, o_ref):
    """y = x * scale + shift (per-channel affine normalization)."""
    o_ref[...] = x_ref[...] * scale_ref[...] + shift_ref[...]


def _bn_apply_residual_kernel(x_ref, scale_ref, shift_ref, res_ref, o_ref):
    """y = x * scale + shift + residual (fused DarknetResidualBlock add)."""
    o_ref[...] = x_ref[...] * scale_ref[...] + shift_ref[...] + res_ref[...]


# ---------------- fused Conv2D -> LeakyReLU -> BatchNorm (training stats) ----------------

def _conv_bn_act(patches, weight_kc, gamma, beta, residual=None, *,
                 tm=TM, tk=TK, matmul_dtype=MATMUL_DTYPE):
    """patches: [M, K] f32, weight_kc: [K, Cout].  Returns [M, Cout] f32."""
    M, K = patches.shape
    Cout = weight_kc.shape[1]

    Mp = pl.cdiv(M, tm) * tm
    Kp = pl.cdiv(K, tk) * tk
    Cp = pl.cdiv(Cout, LANE) * LANE           # lane-dense output channels

    p = jnp.pad(patches, ((0, Mp - M), (0, Kp - K))).astype(matmul_dtype)
    w = jnp.pad(weight_kc.astype(jnp.float32),
                ((0, Kp - K), (0, Cp - Cout))).astype(matmul_dtype)

    mt, kt = Mp // tm, Kp // tk

    # kernel 1: conv matmul + LeakyReLU + fused BN statistics
    act, sums, sqs = pl.pallas_call(
        _conv_act_stats_kernel,
        out_shape=(jax.ShapeDtypeStruct((Mp, Cp), jnp.float32),
                   jax.ShapeDtypeStruct((mt, 1, Cp), jnp.float32),
                   jax.ShapeDtypeStruct((mt, 1, Cp), jnp.float32)),
        grid_spec=pltpu.PrefetchScalarGridSpec(
            num_scalar_prefetch=0,
            grid=(mt, kt),
            in_specs=[pl.BlockSpec((tm, tk), lambda i, k: (i, k)),
                      pl.BlockSpec((tk, Cp), lambda i, k: (k, 0))],
            out_specs=(pl.BlockSpec((tm, Cp), lambda i, k: (i, 0)),
                       pl.BlockSpec((1, 1, Cp), lambda i, k: (i, 0, 0)),
                       pl.BlockSpec((1, 1, Cp), lambda i, k: (i, 0, 0)))),
        compiler_params=pltpu.CompilerParams(
            dimension_semantics=("parallel", "arbitrary")),
    )(p, w)

    # combine partials; padded rows are exactly zero so dividing by the true M is exact
    total_sum = jnp.sum(sums, axis=(0, 1))
    total_sq = jnp.sum(sqs, axis=(0, 1))
    mean = total_sum / M
    var = jnp.maximum(total_sq / M - mean * mean, 0.0)   # biased batch variance
    inv = lax.rsqrt(var + BN_EPS)
    g = jnp.pad(gamma.astype(jnp.float32), (0, Cp - Cout))
    b = jnp.pad(beta.astype(jnp.float32), (0, Cp - Cout))
    scale = (g * inv)[None, :]                           # (1, Cp)
    shift = (b - mean * g * inv)[None, :]                # (1, Cp)

    if residual is None:
        kernel = _bn_apply_kernel
        extra_in, extra_specs = (), ()
    else:
        res = jnp.pad(residual.astype(jnp.float32),
                      ((0, Mp - M), (0, Cp - Cout)))
        kernel = _bn_apply_residual_kernel
        extra_in = (res,)
        extra_specs = (pl.BlockSpec((tm, Cp), lambda i: (i, 0)),)

    # kernel 2: normalize + affine (+ fused residual add)
    out = pl.pallas_call(
        kernel,
        out_shape=jax.ShapeDtypeStruct((Mp, Cp), jnp.float32),
        grid_spec=pltpu.PrefetchScalarGridSpec(
            num_scalar_prefetch=0,
            grid=(mt,),
            in_specs=[pl.BlockSpec((tm, Cp), lambda i: (i, 0)),
                      pl.BlockSpec((1, Cp), lambda i: (0, 0)),
                      pl.BlockSpec((1, Cp), lambda i: (0, 0)),
                      *extra_specs],
            out_specs=pl.BlockSpec((tm, Cp), lambda i: (i, 0))),
        compiler_params=pltpu.CompilerParams(
            dimension_semantics=("parallel",)),
    )(act, scale, shift, *extra_in)

    return out[:M, :Cout]


# ---------------- glue: im2col + DarknetBlock wiring ----------------

def _im2col_nhwc(x, ksz, stride, padding):
    """x: [N, H, W, C] -> patches [N*Ho*Wo, C*ksz*ksz], K ordered (c, dy, dx)."""
    N, H, W, C = x.shape
    if padding:
        x = jnp.pad(x, ((0, 0), (padding, padding), (padding, padding), (0, 0)))
        H += 2 * padding
        W += 2 * padding
    Ho = (H - ksz) // stride + 1
    Wo = (W - ksz) // stride + 1
    cols = []
    for dy in range(ksz):
        for dx in range(ksz):
            cols.append(x[:, dy:dy + stride * Ho:stride,
                          dx:dx + stride * Wo:stride, :])
    p = jnp.stack(cols, axis=-1)                       # [N, Ho, Wo, C, k*k]
    return p.reshape(N * Ho * Wo, C * ksz * ksz), (N, Ho, Wo)


def _w_kc(w):
    """[Cout, Cin, kh, kw] -> [Cin*kh*kw, Cout], matching im2col K ordering."""
    return w.reshape(w.shape[0], -1).T


def darknet_block_forward(x, params):
    """x: [N, Cin, H, W] (NCHW).  params: {'stem': (w,g,b), 'blocks': [((w1,g1,b1),(w2,g2,b2)), ...]}."""
    x_nhwc = jnp.transpose(x, (0, 2, 3, 1)).astype(jnp.float32)

    # stem: Conv2D(in_filters, out_filters, 3, stride=2)
    w, g, b = params["stem"]
    cout = w.shape[0]
    patches, (N, Ho, Wo) = _im2col_nhwc(x_nhwc, 3, 2, 0)
    feat = _conv_bn_act(patches, _w_kc(w), g, b)       # [M, cout]
    M = N * Ho * Wo

    # DarknetResidualBlock chain
    for (w1, g1, b1), (w2, g2, b2) in params["blocks"]:
        half = w1.shape[0]
        # Conv2D(cout, cout//2, 1)
        p1, _ = _im2col_nhwc(feat.reshape(N, Ho, Wo, cout), 1, 1, 0)
        y1 = _conv_bn_act(p1, _w_kc(w1), g1, b1)       # [M, half]
        # Conv2D(cout//2, cout, 3, padding=1) with fused residual add
        p2, _ = _im2col_nhwc(y1.reshape(N, Ho, Wo, half), 3, 1, 1)
        feat = _conv_bn_act(p2, _w_kc(w2), g2, b2, residual=feat)

    return jnp.transpose(feat.reshape(N, Ho, Wo, cout), (0, 3, 1, 2))


# ---------------- pure-JAX reference ----------------

def _conv_bn_act_ref(x, w, gamma, beta, stride, padding):
    y = lax.conv_general_dilated(
        x, w, window_strides=(stride, stride),
        padding=[(padding, padding), (padding, padding)],
        dimension_numbers=("NCHW", "OIHW", "NCHW"))
    y = jnp.where(y >= 0, y, NEG_SLOPE * y)
    m = y.mean(axis=(0, 2, 3), keepdims=True)
    v = ((y - m) ** 2).mean(axis=(0, 2, 3), keepdims=True)
    y = (y - m) / jnp.sqrt(v + BN_EPS)
    return y * gamma.reshape(1, -1, 1, 1) + beta.reshape(1, -1, 1, 1)


def darknet_block_ref(x, params):
    w, g, b = params["stem"]
    y = _conv_bn_act_ref(x, w, g, b, 2, 0)
    for (w1, g1, b1), (w2, g2, b2) in params["blocks"]:
        t = _conv_bn_act_ref(y, w1, g1, b1, 1, 0)
        t = _conv_bn_act_ref(t, w2, g2, b2, 1, 1)
        y = y + t
    return y


# ---------------- demo / correctness check ----------------

if __name__ == "__main__":
    key = jax.random.PRNGKey(0)
    ks = jax.random.split(key, 16)

    N, in_filters, out_filters, blocks = 2, 4, 8, 2
    H = W = 16
    half = out_filters // 2

    x = jax.random.normal(ks[0], (N, in_filters, H, W), jnp.float32)

    def conv_w(k, cout, cin, ksz):
        return jax.random.normal(k, (cout, cin, ksz, ksz), jnp.float32) * 0.1

    params = {
        "stem": (conv_w(ks[1], out_filters, in_filters, 3),
                 1.0 + 0.1 * jax.random.normal(ks[2], (out_filters,), jnp.float32),
                 0.1 * jax.random.normal(ks[3], (out_filters,), jnp.float32)),
        "blocks": [],
    }
    idx = 4
    for _ in range(blocks):
        w1 = conv_w(ks[idx], half, out_filters, 1)
        g1 = 1.0 + 0.1 * jax.random.normal(ks[idx + 1], (half,), jnp.float32)
        b1 = 0.1 * jax.random.normal(ks[idx + 2], (half,), jnp.float32)
        w2 = conv_w(ks[idx + 3], out_filters, half, 3)
        g2 = 1.0 + 0.1 * jax.random.normal(ks[idx + 4], (out_filters,), jnp.float32)
        b2 = 0.1 * jax.random.normal(ks[idx + 5], (out_filters,), jnp.float32)
        params["blocks"].append(((w1, g1, b1), (w2, g2, b2)))
        idx += 6

    fwd = jax.jit(darknet_block_forward)
    out = jax.block_until_ready(fwd(x, params))

    ref = darknet_block_ref(x, params)

    assert out.shape == ref.shape, (out.shape, ref.shape)
    max_err = float(jnp.max(jnp.abs(out - ref)))
    assert jnp.allclose(out, ref, atol=2e-3, rtol=2e-3), max_err
    print("KERNEL_OK")
</pallas_src>

<mosaic_0001>
module attributes {stable_mosaic.version = 11 : i64} {
  func.func @_conv_act_stats_kernel(%arg0: i32, %arg1: i32, %arg2: memref<512x128xf32, #tpu.memory_space<vmem>>, %arg3: memref<128x128xf32, #tpu.memory_space<vmem>>, %arg4: memref<512x128xf32, #tpu.memory_space<vmem>>, %arg5: memref<1x1x128xf32, #tpu.memory_space<vmem>>, %arg6: memref<1x1x128xf32, #tpu.memory_space<vmem>>) attributes {dimension_semantics = [#tpu.dimension_semantics<parallel>, #tpu.dimension_semantics<arbitrary>], iteration_bounds = array<i64: 1, 1>, scalar_prefetch = 0 : i64, scratch_operands = 0 : i64, tpu.core_type = #tpu.core_type<tc>, window_params = [{transform_indices = @transform_0, window_bounds = array<i64: 512, 128>}, {transform_indices = @transform_1, window_bounds = array<i64: 128, 128>}, {transform_indices = @transform_2, window_bounds = array<i64: 512, 128>}, {transform_indices = @transform_3, window_bounds = array<i64: 1, 1, 128>}, {transform_indices = @transform_4, window_bounds = array<i64: 1, 1, 128>}]} {
    %c0_i32 = arith.constant 0 : i32
    %0 = arith.cmpi eq, %arg1, %c0_i32 : i32
    %1 = arith.extui %0 : i1 to i32
    %c0_i32_0 = arith.constant 0 : i32
    %2 = arith.cmpi ne, %1, %c0_i32_0 : i32
    scf.if %2 {
      %cst_10 = arith.constant 0.000000e+00 : f32
      %12 = vector.broadcast %cst_10 : f32 to vector<512x128xf32>
      %c0_11 = arith.constant 0 : index
      %c0_12 = arith.constant 0 : index
      %13 = vector.load %arg4[%c0_11, %c0_12] : memref<512x128xf32, #tpu.memory_space<vmem>>, vector<512x128xf32>
      tpu.vector_store %arg4[%c0_11, %c0_12], %12 {strides = array<i32>} : memref<512x128xf32, #tpu.memory_space<vmem>>, vector<512x128xf32>,
    } else {
    }
    %c0 = arith.constant 0 : index
    %c0_1 = arith.constant 0 : index
    %3 = vector.load %arg4[%c0, %c0_1] : memref<512x128xf32, #tpu.memory_space<vmem>>, vector<512x128xf32>
    %c0_2 = arith.constant 0 : index
    %c0_3 = arith.constant 0 : index
    %4 = vector.load %arg2[%c0_2, %c0_3] : memref<512x128xf32, #tpu.memory_space<vmem>>, vector<512x128xf32>
    %c0_4 = arith.constant 0 : index
    %c0_5 = arith.constant 0 : index
    %5 = vector.load %arg3[%c0_4, %c0_5] : memref<128x128xf32, #tpu.memory_space<vmem>>, vector<128x128xf32>
    %cst = arith.constant dense<0.000000e+00> : vector<512x128xf32>
    %6 = tpu.matmul %4, %5, %cst {dimension_numbers = #tpu.dot_dimension_numbers<[1], [0], [0], [1], [0, 0, 1, 1], [], []>} : vector<512x128xf32>, vector<128x128xf32>, vector<512x128xf32> -> vector<512x128xf32>
    %7 = arith.addf %3, %6 : vector<512x128xf32>
    %c0_6 = arith.constant 0 : index
    %c0_7 = arith.constant 0 : index
    %8 = vector.load %arg4[%c0_6, %c0_7] : memref<512x128xf32, #tpu.memory_space<vmem>>, vector<512x128xf32>
    tpu.vector_store %arg4[%c0_6, %c0_7], %7 {strides = array<i32>} : memref<512x128xf32, #tpu.memory_space<vmem>>, vector<512x128xf32>,
    %c0_i32_8 = arith.constant 0 : i32
    %9 = arith.cmpi eq, %arg1, %c0_i32_8 : i32
    %10 = arith.extui %9 : i1 to i32
    %c0_i32_9 = arith.constant 0 : i32
    %11 = arith.cmpi ne, %10, %c0_i32_9 : i32
    scf.if %11 {
      %c0_10 = arith.constant 0 : index
      %c0_11 = arith.constant 0 : index
      %12 = vector.load %arg4[%c0_10, %c0_11] : memref<512x128xf32, #tpu.memory_space<vmem>>, vector<512x128xf32>
      %cst_12 = arith.constant 0.000000e+00 : f32
      %13 = vector.broadcast %cst_12 : f32 to vector<512x128xf32>
      %14 = arith.cmpf oge, %12, %13 : vector<512x128xf32>
      %cst_13 = arith.constant 1.000000e-01 : f32
      %15 = vector.broadcast %cst_13 : f32 to vector<512x128xf32>
      %16 = arith.mulf %15, %12 : vector<512x128xf32>
      %17 = arith.select %14, %12, %16 : vector<512x128xi1>, vector<512x128xf32>
      %c0_14 = arith.constant 0 : index
      %c0_15 = arith.constant 0 : index
      %18 = vector.load %arg4[%c0_14, %c0_15] : memref<512x128xf32, #tpu.memory_space<vmem>>, vector<512x128xf32>
      tpu.vector_store %arg4[%c0_14, %c0_15], %17 {strides = array<i32>} : memref<512x128xf32, #tpu.memory_space<vmem>>, vector<512x128xf32>,
      %cst_16 = arith.constant dense<0.000000e+00> : vector<128xf32>
      %19 = vector.multi_reduction <add>, %17, %cst_16 [0] : vector<512x128xf32> to vector<128xf32>
      %20 = vector.shape_cast %19 : vector<128xf32> to vector<1x128xf32>
      %21 = vector.shape_cast %20 : vector<1x128xf32> to vector<1x1x128xf32>
      %c0_17 = arith.constant 0 : index
      %c0_18 = arith.constant 0 : index
      %c0_19 = arith.constant 0 : index
      %22 = vector.load %arg5[%c0_17, %c0_18, %c0_19] : memref<1x1x128xf32, #tpu.memory_space<vmem>>, vector<1x1x128xf32>
      tpu.vector_store %arg5[%c0_17, %c0_18, %c0_19], %21 {strides = array<i32>} : memref<1x1x128xf32, #tpu.memory_space<vmem>>, vector<1x1x128xf32>,
      %23 = arith.mulf %17, %17 : vector<512x128xf32>
      %cst_20 = arith.constant dense<0.000000e+00> : vector<128xf32>
      %24 = vector.multi_reduction <add>, %23, %cst_20 [0] : vector<512x128xf32> to vector<128xf32>
      %25 = vector.shape_cast %24 : vector<128xf32> to vector<1x128xf32>
      %26 = vector.shape_cast %25 : vector<1x128xf32> to vector<1x1x128xf32>
      %c0_21 = arith.constant 0 : index
      %c0_22 = arith.constant 0 : index
      %c0_23 = arith.constant 0 : index
      %27 = vector.load %arg6[%c0_21, %c0_22, %c0_23] : memref<1x1x128xf32, #tpu.memory_space<vmem>>, vector<1x1x128xf32>
      tpu.vector_store %arg6[%c0_21, %c0_22, %c0_23], %26 {strides = array<i32>} : memref<1x1x128xf32, #tpu.memory_space<vmem>>, vector<1x1x128xf32>,
    } else {
    }
    return
  }
  func.func @transform_0(%arg0: i32, %arg1: i32) -> (i32, i32) {
    %c0_i32 = arith.constant 0 : i32
    return %arg0, %arg1 : i32, i32
  }
  func.func @transform_1(%arg0: i32, %arg1: i32) -> (i32, i32) {
    %c0_i32 = arith.constant 0 : i32
    %c0_i32_0 = arith.constant 0 : i32
    return %arg1, %c0_i32 : i32, i32
  }
  func.func @transform_2(%arg0: i32, %arg1: i32) -> (i32, i32) {
    %c0_i32 = arith.constant 0 : i32
    %c0_i32_0 = arith.constant 0 : i32
    return %arg0, %c0_i32 : i32, i32
  }
  func.func @transform_3(%arg0: i32, %arg1: i32) -> (i32, i32, i32) {
    %c0_i32 = arith.constant 0 : i32
    %c0_i32_0 = arith.constant 0 : i32
    %c0_i32_1 = arith.constant 0 : i32
    return %arg0, %c0_i32, %c0_i32_0 : i32, i32, i32
  }
  func.func @transform_4(%arg0: i32, %arg1: i32) -> (i32, i32, i32) {
    %c0_i32 = arith.constant 0 : i32
    %c0_i32_0 = arith.constant 0 : i32
    %c0_i32_1 = arith.constant 0 : i32
    return %arg0, %c0_i32, %c0_i32_0 : i32, i32, i32
  }
}

module attributes {stable_mosaic.version = 11 : i64} {
  func.func @_bn_apply_kernel(%arg0: i32, %arg1: memref<512x128xf32, #tpu.memory_space<vmem>>, %arg2: memref<1x128xf32, #tpu.memory_space<vmem>>, %arg3: memref<1x128xf32, #tpu.memory_space<vmem>>, %arg4: memref<512x128xf32, #tpu.memory_space<vmem>>) attributes {dimension_semantics = [#tpu.dimension_semantics<parallel>], iteration_bounds = array<i64: 1>, scalar_prefetch = 0 : i64, scratch_operands = 0 : i64, tpu.core_type = #tpu.core_type<tc>, window_params = [{transform_indices = @transform_0, window_bounds = array<i64: 512, 128>}, {pipeline_mode = #tpu.pipeline_mode<synchronous>, transform_indices = @transform_1, window_bounds = array<i64: 1, 128>}, {pipeline_mode = #tpu.pipeline_mode<synchronous>, transform_indices = @transform_2, window_bounds = array<i64: 1, 128>}, {transform_indices = @transform_3, window_bounds = array<i64: 512, 128>}]} {
    %c0 = arith.constant 0 : index
    %c0_0 = arith.constant 0 : index
    %0 = vector.load %arg1[%c0, %c0_0] : memref<512x128xf32, #tpu.memory_space<vmem>>, vector<512x128xf32>
    %c0_1 = arith.constant 0 : index
    %c0_2 = arith.constant 0 : index
    %1 = vector.load %arg2[%c0_1, %c0_2] : memref<1x128xf32, #tpu.memory_space<vmem>>, vector<1x128xf32>
    %2 = vector.broadcast %1 : vector<1x128xf32> to vector<512x128xf32>
    %3 = arith.mulf %0, %2 : vector<512x128xf32>
    %c0_3 = arith.constant 0 : index
    %c0_4 = arith.constant 0 : index
    %4 = vector.load %arg3[%c0_3, %c0_4] : memref<1x128xf32, #tpu.memory_space<vmem>>, vector<1x128xf32>
    %5 = vector.broadcast %4 : vector<1x128xf32> to vector<512x128xf32>
    %6 = arith.addf %3, %5 : vector<512x128xf32>
    %c0_5 = arith.constant 0 : index
    %c0_6 = arith.constant 0 : index
    %7 = vector.load %arg4[%c0_5, %c0_6] : memref<512x128xf32, #tpu.memory_space<vmem>>, vector<512x128xf32>
    tpu.vector_store %arg4[%c0_5, %c0_6], %6 {strides = array<i32>} : memref<512x128xf32, #tpu.memory_space<vmem>>, vector<512x128xf32>,
    return
  }
  func.func @transform_0(%arg0: i32) -> (i32, i32) {
    %c0_i32 = arith.constant 0 : i32
    %c0_i32_0 = arith.constant 0 : i32
    return %arg0, %c0_i32 : i32, i32
  }
  func.func @transform_1(%arg0: i32) -> (i32, i32) {
    %c0_i32 = arith.constant 0 : i32
    %c0_i32_0 = arith.constant 0 : i32
    %c0_i32_1 = arith.constant 0 : i32
    return %c0_i32, %c0_i32_0 : i32, i32
  }
  func.func @transform_2(%arg0: i32) -> (i32, i32) {
    %c0_i32 = arith.constant 0 : i32
    %c0_i32_0 = arith.constant 0 : i32
    %c0_i32_1 = arith.constant 0 : i32
    return %c0_i32, %c0_i32_0 : i32, i32
  }
  func.func @transform_3(%arg0: i32) -> (i32, i32) {
    %c0_i32 = arith.constant 0 : i32
    %c0_i32_0 = arith.constant 0 : i32
    return %arg0, %c0_i32 : i32, i32
  }
}

module attributes {stable_mosaic.version = 11 : i64} {
  func.func @_bn_apply_residual_kernel(%arg0: i32, %arg1: memref<512x128xf32, #tpu.memory_space<vmem>>, %arg2: memref<1x128xf32, #tpu.memory_space<vmem>>, %arg3: memref<1x128xf32, #tpu.memory_space<vmem>>, %arg4: memref<512x128xf32, #tpu.memory_space<vmem>>, %arg5: memref<512x128xf32, #tpu.memory_space<vmem>>) attributes {dimension_semantics = [#tpu.dimension_semantics<parallel>], iteration_bounds = array<i64: 1>, scalar_prefetch = 0 : i64, scratch_operands = 0 : i64, tpu.core_type = #tpu.core_type<tc>, window_params = [{transform_indices = @transform_0, window_bounds = array<i64: 512, 128>}, {pipeline_mode = #tpu.pipeline_mode<synchronous>, transform_indices = @transform_1, window_bounds = array<i64: 1, 128>}, {pipeline_mode = #tpu.pipeline_mode<synchronous>, transform_indices = @transform_2, window_bounds = array<i64: 1, 128>}, {transform_indices = @transform_3, window_bounds = array<i64: 512, 128>}, {transform_indices = @transform_4, window_bounds = array<i64: 512, 128>}]} {
    %c0 = arith.constant 0 : index
    %c0_0 = arith.constant 0 : index
    %0 = vector.load %arg1[%c0, %c0_0] : memref<512x128xf32, #tpu.memory_space<vmem>>, vector<512x128xf32>
    %c0_1 = arith.constant 0 : index
    %c0_2 = arith.constant 0 : index
    %1 = vector.load %arg2[%c0_1, %c0_2] : memref<1x128xf32, #tpu.memory_space<vmem>>, vector<1x128xf32>
    %2 = vector.broadcast %1 : vector<1x128xf32> to vector<512x128xf32>
    %3 = arith.mulf %0, %2 : vector<512x128xf32>
    %c0_3 = arith.constant 0 : index
    %c0_4 = arith.constant 0 : index
    %4 = vector.load %arg3[%c0_3, %c0_4] : memref<1x128xf32, #tpu.memory_space<vmem>>, vector<1x128xf32>
    %5 = vector.broadcast %4 : vector<1x128xf32> to vector<512x128xf32>
    %6 = arith.addf %3, %5 : vector<512x128xf32>
    %c0_5 = arith.constant 0 : index
    %c0_6 = arith.constant 0 : index
    %7 = vector.load %arg4[%c0_5, %c0_6] : memref<512x128xf32, #tpu.memory_space<vmem>>, vector<512x128xf32>
    %8 = arith.addf %6, %7 : vector<512x128xf32>
    %c0_7 = arith.constant 0 : index
    %c0_8 = arith.constant 0 : index
    %9 = vector.load %arg5[%c0_7, %c0_8] : memref<512x128xf32, #tpu.memory_space<vmem>>, vector<512x128xf32>
    tpu.vector_store %arg5[%c0_7, %c0_8], %8 {strides = array<i32>} : memref<512x128xf32, #tpu.memory_space<vmem>>, vector<512x128xf32>,
    return
  }
  func.func @transform_0(%arg0: i32) -> (i32, i32) {
    %c0_i32 = arith.constant 0 : i32
    %c0_i32_0 = arith.constant 0 : i32
    return %arg0, %c0_i32 : i32, i32
  }
  func.func @transform_1(%arg0: i32) -> (i32, i32) {
    %c0_i32 = arith.constant 0 : i32
    %c0_i32_0 = arith.constant 0 : i32
    %c0_i32_1 = arith.constant 0 : i32
    return %c0_i32, %c0_i32_0 : i32, i32
  }
  func.func @transform_2(%arg0: i32) -> (i32, i32) {
    %c0_i32 = arith.constant 0 : i32
    %c0_i32_0 = arith.constant 0 : i32
    %c0_i32_1 = arith.constant 0 : i32
    return %c0_i32, %c0_i32_0 : i32, i32
  }
  func.func @transform_3(%arg0: i32) -> (i32, i32) {
    %c0_i32 = arith.constant 0 : i32
    %c0_i32_0 = arith.constant 0 : i32
    return %arg0, %c0_i32 : i32, i32
  }
  func.func @transform_4(%arg0: i32) -> (i32, i32) {
    %c0_i32 = arith.constant 0 : i32
    %c0_i32_0 = arith.constant 0 : i32
    return %arg0, %c0_i32 : i32, i32
  }
}

</mosaic_0001>

<bundles_post_ra>
// kernel: darknet_block_forward.11
= control target key start
LH: loop header
LB: loop body
LE: loop exit
PB: predicated region body
PF: predicated region fallthrough
CT: control target
= control target key end

     0   :  { %s832_s0 = inlined_call_operand.vmem [shape: f32[512,128], index: 0, kind: input, shape index: {}]   ;;  %s833_s1 = inlined_call_operand.vmem [shape: f32[1,128], index: 1, kind: input, shape index: {}]   ;;  %s834_s2 = inlined_call_operand.vmem [shape: f32[1,128], index: 2, kind: input, shape index: {}]   ;;  %s835_s3 = inlined_call_operand.vmem [shape: f32[512,128], index: 3, kind: output, shape index: {}]  }
   0x1   :  { %v14_v0 = vld [vmem:[%s832_s0] sm:$0xff]  ;;  %v15_v4 = vld [vmem:[%s832_s0 + $0x8] sm:$0xff]  ;;  %v16_v5 = vld [vmem:[%s832_s0 + $0x10] sm:$0xff] }
   0x2   :  { %v316_v1 = vld [vmem:[%s833_s1] ss:$0 sm:$0xff]  ;;  %v17_v6 = vld [vmem:[%s832_s0 + $0x18] sm:$0xff]  ;;  %v19_v11 = vld [vmem:[%s832_s0 + $0x28] sm:$0xff] }
   0x3   :  { %v321_v2 = vld [vmem:[%s834_s2] ss:$0 sm:$0xff]  ;;  %v85_v3 = vmul.f32 %v316_v1, %v14_v0  ;;  %v86_v7 = vmul.f32 %v316_v1, %v15_v4  ;;  %v87_v8 = vmul.f32 %v316_v1, %v16_v5  ;;  %v88_v9 = vmul.f32 %v316_v1, %v17_v6  ;;  %v20_v12 = vld [vmem:[%s832_s0 + $0x30] sm:$0xff]  ;;  %v21_v17 = vld [vmem:[%s832_s0 + $0x38] sm:$0xff] }
   0x4   :  { %v18_v10 = vld [vmem:[%s832_s0 + $0x20] sm:$0xff]  ;;  %v90_v15 = vmul.f32 %v316_v1, %v19_v11  ;;  %v91_v16 = vmul.f32 %v316_v1, %v20_v12  ;;  %v23_v19 = vld [vmem:[%s832_s0 + $0x48] sm:$0xff]  ;;  %v92_v23 = vmul.f32 %v316_v1, %v21_v17  ;;  %v24_v24 = vld [vmem:[%s832_s0 + $0x50] sm:$0xff] }
   0x5   :  { %v156_v13 = vadd.f32 %v321_v2, %v85_v3  ;;  %v89_v14 = vmul.f32 %v316_v1, %v18_v10  ;;  %v22_v18 = vld [vmem:[%s832_s0 + $0x40] sm:$0xff]  ;;  %v157_v20 = vadd.f32 %v321_v2, %v86_v7  ;;  %v158_v21 = vadd.f32 %v321_v2, %v87_v8  ;;  %v25_v25 = vld [vmem:[%s832_s0 + $0x58] sm:$0xff]  ;;  %v27_v31 = vld [vmem:[%s832_s0 + $0x68] sm:$0xff] }
   0x6   :  { %v159_v22 = vadd.f32 %v321_v2, %v88_v9  ;;  %v26_v26 = vld [vmem:[%s832_s0 + $0x60] sm:$0xff]  ;;  %v161_v28 = vadd.f32 %v321_v2, %v90_v15  ;;  %v162_v29 = vadd.f32 %v321_v2, %v91_v16  ;;  %v93_v30 = vmul.f32 %v316_v1, %v22_v18  ;;  %v28_v32 = vld [vmem:[%s832_s0 + $0x70] sm:$0xff]  ;;  %v29_v33 = vld [vmem:[%s832_s0 + $0x78] sm:$0xff] }
   0x7   :  { %220 = vst [vmem:[%s835_s3] sm:$0xff] %v156_v13  ;;  %v160_v27 = vadd.f32 %v321_v2, %v89_v14  ;;  %221 = vst [vmem:[%s835_s3 + $0x8] sm:$0xff] %v157_v20  ;;  %v163_v34 = vadd.f32 %v321_v2, %v92_v23  ;;  %v94_v35 = vmul.f32 %v316_v1, %v23_v19  ;;  %v30_v38 = vld [vmem:[%s832_s0 + $0x80] sm:$0xff]  ;;  %v31_v43 = vld [vmem:[%s832_s0 + $0x88] sm:$0xff] }
   0x8   :  { %222 = vst [vmem:[%s835_s3 + $0x10] sm:$0xff] %v158_v21  ;;  %223 = vst [vmem:[%s835_s3 + $0x18] sm:$0xff] %v159_v22  ;;  %v95_v36 = vmul.f32 %v316_v1, %v24_v24  ;;  %v96_v37 = vmul.f32 %v316_v1, %v25_v25  ;;  %v164_v39 = vadd.f32 %v321_v2, %v93_v30  ;;  %v32_v44 = vld [vmem:[%s832_s0 + $0x90] sm:$0xff]  ;;  %v33_v45 = vld [vmem:[%s832_s0 + $0x98] sm:$0xff] }
   0x9   :  { %224 = vst [vmem:[%s835_s3 + $0x20] sm:$0xff] %v160_v27  ;;  %225 = vst [vmem:[%s835_s3 + $0x28] sm:$0xff] %v161_v28  ;;  %v97_v40 = vmul.f32 %v316_v1, %v26_v26  ;;  %v98_v41 = vmul.f32 %v316_v1, %v27_v31  ;;  %v99_v42 = vmul.f32 %v316_v1, %v28_v32  ;;  %v34_v50 = vld [vmem:[%s832_s0 + $0xa0] sm:$0xff]  ;;  %v35_v51 = vld [vmem:[%s832_s0 + $0xa8] sm:$0xff] }
   0xa   :  { %226 = vst [vmem:[%s835_s3 + $0x30] sm:$0xff] %v162_v29  ;;  %227 = vst [vmem:[%s835_s3 + $0x38] sm:$0xff] %v163_v34  ;;  %v165_v46 = vadd.f32 %v321_v2, %v94_v35  ;;  %v166_v47 = vadd.f32 %v321_v2, %v95_v36  ;;  %v167_v48 = vadd.f32 %v321_v2, %v96_v37  ;;  %v36_v52 = vld [vmem:[%s832_s0 + $0xb0] sm:$0xff]  ;;  %v37_v57 = vld [vmem:[%s832_s0 + $0xb8] sm:$0xff] }
   0xb   :  { %v100_v49 = vmul.f32 %v316_v1, %v29_v33  ;;  %228 = vst [vmem:[%s835_s3 + $0x40] sm:$0xff] %v164_v39  ;;  %v168_v53 = vadd.f32 %v321_v2, %v97_v40  ;;  %v169_v54 = vadd.f32 %v321_v2, %v98_v41  ;;  %v170_v55 = vadd.f32 %v321_v2, %v99_v42  ;;  %v38_v62 = vld [vmem:[%s832_s0 + $0xc0] sm:$0xff]  ;;  %v39_v5 = vld [vmem:[%s832_s0 + $0xc8] sm:$0xff]  ;;  %v40_v6 = vld [vmem:[%s832_s0 + $0xd0] sm:$0xff] }
   0xc   :  { %v101_v56 = vmul.f32 %v316_v1, %v30_v38  ;;  %229 = vst [vmem:[%s835_s3 + $0x48] sm:$0xff] %v165_v46  ;;  %230 = vst [vmem:[%s835_s3 + $0x50] sm:$0xff] %v166_v47  ;;  %v102_v59 = vmul.f32 %v316_v1, %v31_v43  ;;  %v103_v60 = vmul.f32 %v316_v1, %v32_v44  ;;  %v41_v7 = vld [vmem:[%s832_s0 + $0xd8] sm:$0xff]  ;;  %v42_v12 = vld [vmem:[%s832_s0 + $0xe0] sm:$0xff] }
   0xd   :  { %231 = vst [vmem:[%s835_s3 + $0x58] sm:$0xff] %v167_v48  ;;  %v171_v58 = vadd.f32 %v321_v2, %v100_v49  ;;  %v104_v61 = vmul.f32 %v316_v1, %v33_v45  ;;  %232 = vst [vmem:[%s835_s3 + $0x60] sm:$0xff] %v168_v53  ;;  %v105_v0 = vmul.f32 %v316_v1, %v34_v50  ;;  %v43_v13 = vld [vmem:[%s832_s0 + $0xe8] sm:$0xff]  ;;  %v44_v14 = vld [vmem:[%s832_s0 + $0xf0] sm:$0xff] }
   0xe   :  { %233 = vst [vmem:[%s835_s3 + $0x68] sm:$0xff] %v169_v54  ;;  %234 = vst [vmem:[%s835_s3 + $0x70] sm:$0xff] %v170_v55  ;;  %v172_v63 = vadd.f32 %v321_v2, %v101_v56  ;;  %v106_v3 = vmul.f32 %v316_v1, %v35_v51  ;;  %v107_v4 = vmul.f32 %v316_v1, %v36_v52  ;;  %v45_v19 = vld [vmem:[%s832_s0 + $0xf8] sm:$0xff]  ;;  %v46_v24 = vld [vmem:[%s832_s0 + $0x100] sm:$0xff] }
   0xf   :  { %235 = vst [vmem:[%s835_s3 + $0x78] sm:$0xff] %v171_v58  ;;  %v173_v8 = vadd.f32 %v321_v2, %v102_v59  ;;  %v174_v9 = vadd.f32 %v321_v2, %v103_v60  ;;  %v175_v10 = vadd.f32 %v321_v2, %v104_v61  ;;  %v108_v11 = vmul.f32 %v316_v1, %v37_v57  ;;  %v47_v29 = vld [vmem:[%s832_s0 + $0x108] sm:$0xff]  ;;  %v48_v30 = vld [vmem:[%s832_s0 + $0x110] sm:$0xff]  ;;  %v49_v31 = vld [vmem:[%s832_s0 + $0x118] sm:$0xff] }
  0x10   :  { %236 = vst [vmem:[%s835_s3 + $0x80] sm:$0xff] %v172_v63  ;;  %v176_v15 = vadd.f32 %v321_v2, %v105_v0  ;;  %v177_v16 = vadd.f32 %v321_v2, %v106_v3  ;;  %v178_v17 = vadd.f32 %v321_v2, %v107_v4  ;;  %v109_v18 = vmul.f32 %v316_v1, %v38_v62  ;;  %v50_v36 = vld [vmem:[%s832_s0 + $0x120] sm:$0xff]  ;;  %v51_v37 = vld [vmem:[%s832_s0 + $0x128] sm:$0xff]  ;;  %v52_v38 = vld [vmem:[%s832_s0 + $0x130] sm:$0xff] }
  0x11   :  { %237 = vst [vmem:[%s835_s3 + $0x88] sm:$0xff] %v173_v8  ;;  %238 = vst [vmem:[%s835_s3 + $0x90] sm:$0xff] %v174_v9  ;;  %v179_v20 = vadd.f32 %v321_v2, %v108_v11  ;;  %v110_v21 = vmul.f32 %v316_v1, %v39_v5  ;;  %v111_v22 = vmul.f32 %v316_v1, %v40_v6  ;;  %v53_v43 = vld [vmem:[%s832_s0 + $0x138] sm:$0xff]  ;;  %v54_v48 = vld [vmem:[%s832_s0 + $0x140] sm:$0xff] }
  0x12   :  { %239 = vst [vmem:[%s835_s3 + $0x98] sm:$0xff] %v175_v10  ;;  %v112_v23 = vmul.f32 %v316_v1, %v41_v7  ;;  %240 = vst [vmem:[%s835_s3 + $0xa0] sm:$0xff] %v176_v15  ;;  %v180_v25 = vadd.f32 %v321_v2, %v109_v18  ;;  %v113_v26 = vmul.f32 %v316_v1, %v42_v12  ;;  %v55_v53 = vld [vmem:[%s832_s0 + $0x148] sm:$0xff]  ;;  %v56_v54 = vld [vmem:[%s832_s0 + $0x150] sm:$0xff] }
  0x13   :  { %241 = vst [vmem:[%s835_s3 + $0xa8] sm:$0xff] %v177_v16  ;;  %242 = vst [vmem:[%s835_s3 + $0xb0] sm:$0xff] %v178_v17  ;;  %v114_v27 = vmul.f32 %v316_v1, %v43_v13  ;;  %v115_v28 = vmul.f32 %v316_v1, %v44_v14  ;;  %v181_v32 = vadd.f32 %v321_v2, %v110_v21  ;;  %v57_v55 = vld [vmem:[%s832_s0 + $0x158] sm:$0xff]  ;;  %v58_v60 = vld [vmem:[%s832_s0 + $0x160] sm:$0xff] }
  0x14   :  { %243 = vst [vmem:[%s835_s3 + $0xb8] sm:$0xff] %v179_v20  ;;  %v182_v33 = vadd.f32 %v321_v2, %v111_v22  ;;  %v183_v34 = vadd.f32 %v321_v2, %v112_v23  ;;  %v116_v35 = vmul.f32 %v316_v1, %v45_v19  ;;  %244 = vst [vmem:[%s835_s3 + $0xc0] sm:$0xff] %v180_v25  ;;  %v59_v61 = vld [vmem:[%s832_s0 + $0x168] sm:$0xff]  ;;  %v60_v62 = vld [vmem:[%s832_s0 + $0x170] sm:$0xff] }
  0x15   :  { %v184_v39 = vadd.f32 %v321_v2, %v113_v26  ;;  %v185_v40 = vadd.f32 %v321_v2, %v114_v27  ;;  %v186_v41 = vadd.f32 %v321_v2, %v115_v28  ;;  %v117_v42 = vmul.f32 %v316_v1, %v46_v24  ;;  %245 = vst [vmem:[%s835_s3 + $0xc8] sm:$0xff] %v181_v32  ;;  %v61_v5 = vld [vmem:[%s832_s0 + $0x178] sm:$0xff]  ;;  %v62_v10 = vld [vmem:[%s832_s0 + $0x180] sm:$0xff]  ;;  %v63_v15 = vld [vmem:[%s832_s0 + $0x188] sm:$0xff] }
  0x16   :  { %246 = vst [vmem:[%s835_s3 + $0xd0] sm:$0xff] %v182_v33  ;;  %247 = vst [vmem:[%s835_s3 + $0xd8] sm:$0xff] %v183_v34  ;;  %v187_v44 = vadd.f32 %v321_v2, %v116_v35  ;;  %v118_v45 = vmul.f32 %v316_v1, %v47_v29  ;;  %v119_v46 = vmul.f32 %v316_v1, %v48_v30  ;;  %v64_v16 = vld [vmem:[%s832_s0 + $0x190] sm:$0xff]  ;;  %v65_v17 = vld [vmem:[%s832_s0 + $0x198] sm:$0xff] }
  0x17   :  { %v120_v47 = vmul.f32 %v316_v1, %v49_v31  ;;  %248 = vst [vmem:[%s835_s3 + $0xe0] sm:$0xff] %v184_v39  ;;  %249 = vst [vmem:[%s835_s3 + $0xe8] sm:$0xff] %v185_v40  ;;  %v188_v49 = vadd.f32 %v321_v2, %v117_v42  ;;  %v121_v50 = vmul.f32 %v316_v1, %v50_v36  ;;  %v66_v22 = vld [vmem:[%s832_s0 + $0x1a0] sm:$0xff]  ;;  %v67_v23 = vld [vmem:[%s832_s0 + $0x1a8] sm:$0xff] }
  0x18   :  { %250 = vst [vmem:[%s835_s3 + $0xf0] sm:$0xff] %v186_v41  ;;  %v122_v51 = vmul.f32 %v316_v1, %v51_v37  ;;  %v123_v52 = vmul.f32 %v316_v1, %v52_v38  ;;  %251 = vst [vmem:[%s835_s3 + $0xf8] sm:$0xff] %v187_v44  ;;  %v189_v56 = vadd.f32 %v321_v2, %v118_v45  ;;  %v68_v24 = vld [vmem:[%s832_s0 + $0x1b0] sm:$0xff]  ;;  %v69_v29 = vld [vmem:[%s832_s0 + $0x1b8] sm:$0xff] }
  0x19   :  { %v190_v57 = vadd.f32 %v321_v2, %v119_v46  ;;  %v191_v58 = vadd.f32 %v321_v2, %v120_v47  ;;  %v124_v59 = vmul.f32 %v316_v1, %v53_v43  ;;  %252 = vst [vmem:[%s835_s3 + $0x100] sm:$0xff] %v188_v49  ;;  %v192_v63 = vadd.f32 %v321_v2, %v121_v50  ;;  %v70_v34 = vld [vmem:[%s832_s0 + $0x1c0] sm:$0xff]  ;;  %v71_v39 = vld [vmem:[%s832_s0 + $0x1c8] sm:$0xff]  ;;  %v72_v40 = vld [vmem:[%s832_s0 + $0x1d0] sm:$0xff] }
  0x1a   :  { %v193_v0 = vadd.f32 %v321_v2, %v122_v51  ;;  %v194_v3 = vadd.f32 %v321_v2, %v123_v52  ;;  %v125_v4 = vmul.f32 %v316_v1, %v54_v48  ;;  %253 = vst [vmem:[%s835_s3 + $0x108] sm:$0xff] %v189_v56  ;;  %v126_v7 = vmul.f32 %v316_v1, %v55_v53  ;;  %v73_v41 = vld [vmem:[%s832_s0 + $0x1d8] sm:$0xff]  ;;  %v74_v46 = vld [vmem:[%s832_s0 + $0x1e0] sm:$0xff]  ;;  %v75_v47 = vld [vmem:[%s832_s0 + $0x1e8] sm:$0xff] }
  0x1b   :  { %254 = vst [vmem:[%s835_s3 + $0x110] sm:$0xff] %v190_v57  ;;  %255 = vst [vmem:[%s835_s3 + $0x118] sm:$0xff] %v191_v58  ;;  %v195_v6 = vadd.f32 %v321_v2, %v124_v59  ;;  %v127_v8 = vmul.f32 %v316_v1, %v56_v54  ;;  %v128_v9 = vmul.f32 %v316_v1, %v57_v55  ;;  %v76_v48 = vld [vmem:[%s832_s0 + $0x1f0] sm:$0xff]  ;;  %v77_v53 = vld [vmem:[%s832_s0 + $0x1f8] sm:$0xff] }
  0x1c   :  { %256 = vst [vmem:[%s835_s3 + $0x120] sm:$0xff] %v192_v63  ;;  %257 = vst [vmem:[%s835_s3 + $0x128] sm:$0xff] %v193_v0  ;;  %v196_v11 = vadd.f32 %v321_v2, %v125_v4  ;;  %v129_v12 = vmul.f32 %v316_v1, %v58_v60  ;;  %v130_v13 = vmul.f32 %v316_v1, %v59_v61 }
  0x1d   :  { %258 = vst [vmem:[%s835_s3 + $0x130] sm:$0xff] %v194_v3  ;;  %v131_v14 = vmul.f32 %v316_v1, %v60_v62  ;;  %259 = vst [vmem:[%s835_s3 + $0x138] sm:$0xff] %v195_v6  ;;  %v197_v18 = vadd.f32 %v321_v2, %v126_v7  ;;  %v198_v19 = vadd.f32 %v321_v2, %v127_v8 }
  0x1e   :  { %v199_v20 = vadd.f32 %v321_v2, %v128_v9  ;;  %v132_v21 = vmul.f32 %v316_v1, %v61_v5  ;;  %260 = vst [vmem:[%s835_s3 + $0x140] sm:$0xff] %v196_v11  ;;  %v200_v25 = vadd.f32 %v321_v2, %v129_v12  ;;  %v201_v26 = vadd.f32 %v321_v2, %v130_v13 }
  0x1f   :  { %v202_v27 = vadd.f32 %v321_v2, %v131_v14  ;;  %v133_v28 = vmul.f32 %v316_v1, %v62_v10  ;;  %261 = vst [vmem:[%s835_s3 + $0x148] sm:$0xff] %v197_v18  ;;  %262 = vst [vmem:[%s835_s3 + $0x150] sm:$0xff] %v198_v19  ;;  %v134_v31 = vmul.f32 %v316_v1, %v63_v15 }
  0x20   :  { %263 = vst [vmem:[%s835_s3 + $0x158] sm:$0xff] %v199_v20  ;;  %v203_v30 = vadd.f32 %v321_v2, %v132_v21  ;;  %v135_v32 = vmul.f32 %v316_v1, %v64_v16  ;;  %v136_v33 = vmul.f32 %v316_v1, %v65_v17  ;;  %264 = vst [vmem:[%s835_s3 + $0x160] sm:$0xff] %v200_v25 }
  0x21   :  { %265 = vst [vmem:[%s835_s3 + $0x168] sm:$0xff] %v201_v26  ;;  %266 = vst [vmem:[%s835_s3 + $0x170] sm:$0xff] %v202_v27  ;;  %v204_v35 = vadd.f32 %v321_v2, %v133_v28  ;;  %v137_v36 = vmul.f32 %v316_v1, %v66_v22  ;;  %v138_v37 = vmul.f32 %v316_v1, %v67_v23 }
  0x22   :  { %v139_v38 = vmul.f32 %v316_v1, %v68_v24  ;;  %267 = vst [vmem:[%s835_s3 + $0x178] sm:$0xff] %v203_v30  ;;  %v205_v42 = vadd.f32 %v321_v2, %v134_v31  ;;  %v206_v43 = vadd.f32 %v321_v2, %v135_v32  ;;  %v207_v44 = vadd.f32 %v321_v2, %v136_v33 }
  0x23   :  { %v140_v45 = vmul.f32 %v316_v1, %v69_v29  ;;  %268 = vst [vmem:[%s835_s3 + $0x180] sm:$0xff] %v204_v35  ;;  %v208_v49 = vadd.f32 %v321_v2, %v137_v36  ;;  %v209_v50 = vadd.f32 %v321_v2, %v138_v37  ;;  %v141_v52 = vmul.f32 %v316_v1, %v70_v34 }
  0x24   :  { %v210_v51 = vadd.f32 %v321_v2, %v139_v38  ;;  %269 = vst [vmem:[%s835_s3 + $0x188] sm:$0xff] %v205_v42  ;;  %270 = vst [vmem:[%s835_s3 + $0x190] sm:$0xff] %v206_v43  ;;  %v142_v55 = vmul.f32 %v316_v1, %v71_v39  ;;  %v143_v56 = vmul.f32 %v316_v1, %v72_v40 }
  0x25   :  { %271 = vst [vmem:[%s835_s3 + $0x198] sm:$0xff] %v207_v44  ;;  %v211_v54 = vadd.f32 %v321_v2, %v140_v45  ;;  %v144_v57 = vmul.f32 %v316_v1, %v73_v41  ;;  %272 = vst [vmem:[%s835_s3 + $0x1a0] sm:$0xff] %v208_v49  ;;  %v212_v58 = vadd.f32 %v321_v2, %v141_v52 }
  0x26   :  { %273 = vst [vmem:[%s835_s3 + $0x1a8] sm:$0xff] %v209_v50  ;;  %274 = vst [vmem:[%s835_s3 + $0x1b0] sm:$0xff] %v210_v51  ;;  %v145_v59 = vmul.f32 %v316_v1, %v74_v46  ;;  %v146_v60 = vmul.f32 %v316_v1, %v75_v47  ;;  %v147_v61 = vmul.f32 %v316_v1, %v76_v48 }
  0x27   :  { %275 = vst [vmem:[%s835_s3 + $0x1b8] sm:$0xff] %v211_v54  ;;  %v213_v62 = vadd.f32 %v321_v2, %v142_v55  ;;  %v214_v63 = vadd.f32 %v321_v2, %v143_v56  ;;  %v215_v0 = vadd.f32 %v321_v2, %v144_v57  ;;  %v148_v3 = vmul.f32 %v316_v1, %v77_v53 }
  0x28   :  { %276 = vst [vmem:[%s835_s3 + $0x1c0] sm:$0xff] %v212_v58  ;;  %v216_v4 = vadd.f32 %v321_v2, %v145_v59  ;;  %v217_v5 = vadd.f32 %v321_v2, %v146_v60  ;;  %v218_v6 = vadd.f32 %v321_v2, %v147_v61 }
  0x29   :  { %277 = vst [vmem:[%s835_s3 + $0x1c8] sm:$0xff] %v213_v62  ;;  %278 = vst [vmem:[%s835_s3 + $0x1d0] sm:$0xff] %v214_v63  ;;  %v219_v1 = vadd.f32 %v321_v2, %v148_v3 }
  0x2a   :  { %279 = vst [vmem:[%s835_s3 + $0x1d8] sm:$0xff] %v215_v0  ;;  %280 = vst [vmem:[%s835_s3 + $0x1e0] sm:$0xff] %v216_v4 }
  0x2b   :  { %281 = vst [vmem:[%s835_s3 + $0x1e8] sm:$0xff] %v217_v5  ;;  %282 = vst [vmem:[%s835_s3 + $0x1f0] sm:$0xff] %v218_v6 }
  0x2c   :  { %283 = vst [vmem:[%s835_s3 + $0x1f8] sm:$0xff] %v219_v1 }

// kernel: darknet_block_forward.10
= control target key start
LH: loop header
LB: loop body
LE: loop exit
PB: predicated region body
PF: predicated region fallthrough
CT: control target
= control target key end

     0   :  { %s2266_s1 = inlined_call_operand.vmem [shape: f32[128,128], index: 1, kind: input, shape index: {}]   ;;  %s2267_s0 = inlined_call_operand.vmem [shape: f32[512,128], index: 0, kind: input, shape index: {}]   ;;  %s2268_s2 = inlined_call_operand.vmem [shape: f32[512,128], index: 2, kind: output, shape index: {0}]   ;;  %s2269_s3 = inlined_call_operand.vmem [shape: f32[1,1,128], index: 3, kind: output, shape index: {1}]   ;;  %s2270_s4 = inlined_call_operand.vmem [shape: f32[1,1,128], index: 4, kind: output, shape index: {2}]  }
   0x1   :  { %v225_v0 = vld [vmem:[%s2266_s1 + $0x78] sm:$0xff]  ;;  %v224_v1 = vld [vmem:[%s2266_s1 + $0x70] sm:$0xff]  ;;  %v223_v2 = vld [vmem:[%s2266_s1 + $0x68] sm:$0xff] }
   0x2   :  { %1358 = vmatprep.subr.mxu0 %v225_v0  ;;  %1486 = vmatprep.subr.mxu1 %v225_v0  ;;  %v222_v3 = vld [vmem:[%s2266_s1 + $0x60] sm:$0xff]  ;;  %v221_v5 = vld [vmem:[%s2266_s1 + $0x58] sm:$0xff]  ;;  %v220_v6 = vld [vmem:[%s2266_s1 + $0x50] sm:$0xff] }
   0x3   :  { %1359 = vmatpush3.msra.mxu0 %v225_v0  ;;  %1502 = vmatpush3.msra.mxu1 %v225_v0  ;;  %v146_v4 = vld [vmem:[%s2267_s0] sm:$0xff]  ;;  %v219_v7 = vld [vmem:[%s2266_s1 + $0x48] sm:$0xff]  ;;  %v217_v9 = vld [vmem:[%s2266_s1 + $0x38] sm:$0xff] }
   0x4   :  { %1360 = vmatprep.subr.mxu0 %v224_v1  ;;  %1487 = vmatprep.subr.mxu1 %v224_v1  ;;  %v218_v8 = vld [vmem:[%s2266_s1 + $0x40] sm:$0xff]  ;;  %v216_v10 = vld [vmem:[%s2266_s1 + $0x30] sm:$0xff]  ;;  %v215_v11 = vld [vmem:[%s2266_s1 + $0x28] sm:$0xff] }
   0x5   :  { %1361 = vmatpush3.msra.mxu0 %v224_v1  ;;  %1503 = vmatpush3.msra.mxu1 %v224_v1  ;;  %v214_v12 = vld [vmem:[%s2266_s1 + $0x20] sm:$0xff]  ;;  %v213_v13 = vld [vmem:[%s2266_s1 + $0x18] sm:$0xff]  ;;  %v212_v14 = vld [vmem:[%s2266_s1 + $0x10] sm:$0xff] }
   0x6   :  { %1362 = vmatprep.subr.mxu0 %v223_v2  ;;  %1488 = vmatprep.subr.mxu1 %v223_v2  ;;  %v211_v15 = vld [vmem:[%s2266_s1 + $0x8] sm:$0xff]  ;;  %v210_v16 = vld [vmem:[%s2266_s1] sm:$0xff]  ;;  %v148_v18 = vld [vmem:[%s2267_s0 + $0x10] sm:$0xff] }
   0x7   :  { %1363 = vmatpush3.msra.mxu0 %v223_v2  ;;  %1390 = vmatprep.mubr.f32.mxu0 %v146_v4  ;;  %v147_v17 = vld [vmem:[%s2267_s0 + $0x8] sm:$0xff]  ;;  %v178_v19 = vld [vmem:[%s2267_s0 + $0x100] sm:$0xff]  ;;  %v180_v21 = vld [vmem:[%s2267_s0 + $0x110] sm:$0xff] }
   0x8   :  { %1364 = vmatprep.subr.mxu0 %v222_v3  ;;  %1504 = vmatpush3.msra.mxu1 %v223_v2  ;;  %v179_v20 = vld [vmem:[%s2267_s0 + $0x108] sm:$0xff]  ;;  %v149_v22 = vld [vmem:[%s2267_s0 + $0x18] sm:$0xff]  ;;  %v150_v23 = vld [vmem:[%s2267_s0 + $0x20] sm:$0xff] }
   0x9   :  { %1365 = vmatpush3.msra.mxu0 %v222_v3  ;;  %1489 = vmatprep.subr.mxu1 %v222_v3  ;;  %v181_v24 = vld [vmem:[%s2267_s0 + $0x118] sm:$0xff]  ;;  %v182_v25 = vld [vmem:[%s2267_s0 + $0x120] sm:$0xff]  ;;  %v151_v26 = vld [vmem:[%s2267_s0 + $0x28] sm:$0xff] }
   0xa   :  { %1366 = vmatprep.subr.mxu0 %v221_v5  ;;  %1505 = vmatpush3.msra.mxu1 %v222_v3  ;;  %v152_v27 = vld [vmem:[%s2267_s0 + $0x30] sm:$0xff]  ;;  %v183_v28 = vld [vmem:[%s2267_s0 + $0x128] sm:$0xff]  ;;  %v153_v30 = vld [vmem:[%s2267_s0 + $0x38] sm:$0xff] }
   0xb   :  { %1367 = vmatpush3.msra.mxu0 %v221_v5  ;;  %1490 = vmatprep.subr.mxu1 %v221_v5  ;;  %v184_v29 = vld [vmem:[%s2267_s0 + $0x130] sm:$0xff]  ;;  %v154_v31 = vld [vmem:[%s2267_s0 + $0x40] sm:$0xff]  ;;  %v185_v32 = vld [vmem:[%s2267_s0 + $0x138] sm:$0xff] }
   0xc   :  { %1368 = vmatprep.subr.mxu0 %v220_v6  ;;  %1506 = vmatpush3.msra.mxu1 %v221_v5  ;;  %v186_v33 = vld [vmem:[%s2267_s0 + $0x140] sm:$0xff]  ;;  %v155_v34 = vld [vmem:[%s2267_s0 + $0x48] sm:$0xff]  ;;  %v156_v35 = vld [vmem:[%s2267_s0 + $0x50] sm:$0xff] }
   0xd   :  { %1369 = vmatpush3.msra.mxu0 %v220_v6  ;;  %1491 = vmatprep.subr.mxu1 %v220_v6  ;;  %v187_v36 = vld [vmem:[%s2267_s0 + $0x148] sm:$0xff]  ;;  %v188_v37 = vld [vmem:[%s2267_s0 + $0x150] sm:$0xff]  ;;  %v157_v38 = vld [vmem:[%s2267_s0 + $0x58] sm:$0xff] }
   0xe   :  { %1370 = vmatprep.subr.mxu0 %v219_v7  ;;  %1507 = vmatpush3.msra.mxu1 %v220_v6  ;;  %v158_v39 = vld [vmem:[%s2267_s0 + $0x60] sm:$0xff]  ;;  %v189_v40 = vld [vmem:[%s2267_s0 + $0x158] sm:$0xff]  ;;  %v159_v42 = vld [vmem:[%s2267_s0 + $0x68] sm:$0xff] }
   0xf   :  { %1371 = vmatpush3.msra.mxu0 %v219_v7  ;;  %1492 = vmatprep.subr.mxu1 %v219_v7  ;;  %v190_v41 = vld [vmem:[%s2267_s0 + $0x160] sm:$0xff]  ;;  %v160_v43 = vld [vmem:[%s2267_s0 + $0x70] sm:$0xff]  ;;  %v191_v44 = vld [vmem:[%s2267_s0 + $0x168] sm:$0xff] }
  0x10   :  { %1372 = vmatprep.subr.mxu0 %v218_v8  ;;  %1508 = vmatpush3.msra.mxu1 %v219_v7  ;;  %v192_v45 = vld [vmem:[%s2267_s0 + $0x170] sm:$0xff]  ;;  %v161_v46 = vld [vmem:[%s2267_s0 + $0x78] sm:$0xff]  ;;  %v162_v47 = vld [vmem:[%s2267_s0 + $0x80] sm:$0xff] }
  0x11   :  { %1373 = vmatpush3.msra.mxu0 %v218_v8  ;;  %1493 = vmatprep.subr.mxu1 %v218_v8  ;;  %v193_v48 = vld [vmem:[%s2267_s0 + $0x178] sm:$0xff]  ;;  %v194_v49 = vld [vmem:[%s2267_s0 + $0x180] sm:$0xff]  ;;  %v163_v50 = vld [vmem:[%s2267_s0 + $0x88] sm:$0xff] }
  0x12   :  { %1374 = vmatprep.subr.mxu0 %v217_v9  ;;  %1509 = vmatpush3.msra.mxu1 %v218_v8  ;;  %v164_v51 = vld [vmem:[%s2267_s0 + $0x90] sm:$0xff]  ;;  %v195_v52 = vld [vmem:[%s2267_s0 + $0x188] sm:$0xff]  ;;  %v165_v54 = vld [vmem:[%s2267_s0 + $0x98] sm:$0xff] }
  0x13   :  { %1375 = vmatpush3.msra.mxu0 %v217_v9  ;;  %1494 = vmatprep.subr.mxu1 %v217_v9  ;;  %v196_v53 = vld [vmem:[%s2267_s0 + $0x190] sm:$0xff]  ;;  %v166_v55 = vld [vmem:[%s2267_s0 + $0xa0] sm:$0xff]  ;;  %v197_v56 = vld [vmem:[%s2267_s0 + $0x198] sm:$0xff] }
  0x14   :  { %1376 = vmatprep.subr.mxu0 %v216_v10  ;;  %1510 = vmatpush3.msra.mxu1 %v217_v9  ;;  %v198_v57 = vld [vmem:[%s2267_s0 + $0x1a0] sm:$0xff]  ;;  %v167_v58 = vld [vmem:[%s2267_s0 + $0xa8] sm:$0xff]  ;;  %v168_v59 = vld [vmem:[%s2267_s0 + $0xb0] sm:$0xff] }
  0x15   :  { %1377 = vmatpush3.msra.mxu0 %v216_v10  ;;  %1495 = vmatprep.subr.mxu1 %v216_v10  ;;  %v199_v60 = vld [vmem:[%s2267_s0 + $0x1a8] sm:$0xff]  ;;  %v200_v61 = vld [vmem:[%s2267_s0 + $0x1b0] sm:$0xff]  ;;  %v169_v62 = vld [vmem:[%s2267_s0 + $0xb8] sm:$0xff] }
  0x16   :  { %1378 = vmatprep.subr.mxu0 %v215_v11  ;;  %1511 = vmatpush3.msra.mxu1 %v216_v10  ;;  %v170_v63 = vld [vmem:[%s2267_s0 + $0xc0] sm:$0xff]  ;;  %v201_v0 = vld [vmem:[%s2267_s0 + $0x1b8] sm:$0xff]  ;;  %v171_v2 = vld [vmem:[%s2267_s0 + $0xc8] sm:$0xff] }
  0x17   :  { %1379 = vmatpush3.msra.mxu0 %v215_v11  ;;  %1496 = vmatprep.subr.mxu1 %v215_v11  ;;  %v202_v1 = vld [vmem:[%s2267_s0 + $0x1c0] sm:$0xff]  ;;  %v172_v3 = vld [vmem:[%s2267_s0 + $0xd0] sm:$0xff]  ;;  %v203_v4 = vld [vmem:[%s2267_s0 + $0x1c8] sm:$0xff] }
  0x18   :  { %1380 = vmatprep.subr.mxu0 %v214_v12  ;;  %1512 = vmatpush3.msra.mxu1 %v215_v11  ;;  %v204_v5 = vld [vmem:[%s2267_s0 + $0x1d0] sm:$0xff]  ;;  %v173_v6 = vld [vmem:[%s2267_s0 + $0xd8] sm:$0xff]  ;;  %v174_v7 = vld [vmem:[%s2267_s0 + $0xe0] sm:$0xff] }
  0x19   :  { %1381 = vmatpush3.msra.mxu0 %v214_v12  ;;  %1497 = vmatprep.subr.mxu1 %v214_v12  ;;  %v205_v8 = vld [vmem:[%s2267_s0 + $0x1d8] sm:$0xff]  ;;  %v206_v9 = vld [vmem:[%s2267_s0 + $0x1e0] sm:$0xff]  ;;  %v175_v10 = vld [vmem:[%s2267_s0 + $0xe8] sm:$0xff] }
  0x1a   :  { %1382 = vmatprep.subr.mxu0 %v213_v13  ;;  %1513 = vmatpush3.msra.mxu1 %v214_v12  ;;  %v176_v11 = vld [vmem:[%s2267_s0 + $0xf0] sm:$0xff]  ;;  %v207_v12 = vld [vmem:[%s2267_s0 + $0x1e8] sm:$0xff] }
  0x1b   :  { %1383 = vmatpush3.msra.mxu0 %v213_v13  ;;  %1498 = vmatprep.subr.mxu1 %v213_v13 }
  0x1c   :  { %1384 = vmatprep.subr.mxu0 %v212_v14  ;;  %1514 = vmatpush3.msra.mxu1 %v213_v13  ;;  %v208_v13 = vld [vmem:[%s2267_s0 + $0x1f0] sm:$0xff] }
  0x1d   :  { %1385 = vmatpush3.msra.mxu0 %v212_v14  ;;  %1499 = vmatprep.subr.mxu1 %v212_v14 }
  0x1e   :  { %1386 = vmatprep.subr.mxu0 %v211_v15  ;;  %1515 = vmatpush3.msra.mxu1 %v212_v14  ;;  %v177_v14 = vld [vmem:[%s2267_s0 + $0xf8] sm:$0xff] }
  0x1f   :  { %1387 = vmatpush3.msra.mxu0 %v211_v15  ;;  %1500 = vmatprep.subr.mxu1 %v211_v15 }
  0x20   :  { %1388 = vmatprep.subr.mxu0 %v210_v16  ;;  %1516 = vmatpush3.msra.mxu1 %v211_v15  ;;  %v209_v15 = vld [vmem:[%s2267_s0 + $0x1f8] sm:$0xff] }
  0x21   :  { %1389 = vmatpush3.msra.mxu0 %v210_v16  ;;  %1501 = vmatprep.subr.mxu1 %v210_v16 }
  0x22   :  { %1391 = vmatmul.mubr.f32.vlgmr.msra.gmra.mxu0 %v147_v17  ;;  %1517 = vmatpush3.msra.mxu1 %v210_v16 }
  0x23   :  { %1393 = vmatprep.mubr.f32.mxu0 %v148_v18  ;;  %1438 = vmatprep.mubr.f32.mxu1 %v178_v19 }
  0x24   :  { %1439 = vmatmul.mubr.f32.vlgmr.msra.gmra.mxu1 %v179_v20 }
  0x25   :  { %1441 = vmatprep.mubr.f32.mxu1 %v180_v21 }
  0x26   :  { %1394 = vmatmul.mubr.f32.gmra.mxu0 %v149_v22 }
  0x27   :  { %1396 = vmatprep.mubr.f32.mxu0 %v150_v23 }
  0x28   :  { %1442 = vmatmul.mubr.f32.gmra.mxu1 %v181_v24 }
  0x29   :  { %1444 = vmatprep.mubr.f32.mxu1 %v182_v25 }
  0x2a   :  { %1397 = vmatmul.mubr.f32.gmra.mxu0 %v151_v26 }
  0x2b   :  { %1399 = vmatprep.mubr.f32.mxu0 %v152_v27 }
  0x2c   :  { %1445 = vmatmul.mubr.f32.gmra.mxu1 %v183_v28 }
  0x2d   :  { %1447 = vmatprep.mubr.f32.mxu1 %v184_v29 }
  0x2e   :  { %1400 = vmatmul.mubr.f32.gmra.mxu0 %v153_v30 }
  0x2f   :  { %1402 = vmatprep.mubr.f32.mxu0 %v154_v31 }
  0x30   :  { %1448 = vmatmul.mubr.f32.gmra.mxu1 %v185_v32 }
  0x31   :  { %1450 = vmatprep.mubr.f32.mxu1 %v186_v33 }
  0x32   :  { %1403 = vmatmul.mubr.f32.gmra.mxu0 %v155_v34 }
  0x33   :  { %1405 = vmatprep.mubr.f32.mxu0 %v156_v35 }
  0x34   :  { %1451 = vmatmul.mubr.f32.gmra.mxu1 %v187_v36 }
  0x35   :  { %1453 = vmatprep.mubr.f32.mxu1 %v188_v37 }
  0x36   :  { %1406 = vmatmul.mubr.f32.gmra.mxu0 %v157_v38 }
  0x37   :  { %1408 = vmatprep.mubr.f32.mxu0 %v158_v39 }
  0x38   :  { %1454 = vmatmul.mubr.f32.gmra.mxu1 %v189_v40 }
  0x39   :  { %1456 = vmatprep.mubr.f32.mxu1 %v190_v41 }
  0x3a   :  { %1409 = vmatmul.mubr.f32.gmra.mxu0 %v159_v42 }
  0x3b   :  { %1411 = vmatprep.mubr.f32.mxu0 %v160_v43 }
  0x3c   :  { %1457 = vmatmul.mubr.f32.gmra.mxu1 %v191_v44 }
  0x3d   :  { %1459 = vmatprep.mubr.f32.mxu1 %v192_v45 }
  0x3e   :  { %1412 = vmatmul.mubr.f32.gmra.mxu0 %v161_v46 }
  0x3f   :  { %1414 = vmatprep.mubr.f32.mxu0 %v162_v47 }
  0x40   :  { %1460 = vmatmul.mubr.f32.gmra.mxu1 %v193_v48 }
  0x41   :  { %1462 = vmatprep.mubr.f32.mxu1 %v194_v49 }
  0x42   :  { %1415 = vmatmul.mubr.f32.gmra.mxu0 %v163_v50 }
  0x43   :  { %1417 = vmatprep.mubr.f32.mxu0 %v164_v51 }
  0x44   :  { %1463 = vmatmul.mubr.f32.gmra.mxu1 %v195_v52 }
  0x45   :  { %1465 = vmatprep.mubr.f32.mxu1 %v196_v53 }
  0x46   :  { %1418 = vmatmul.mubr.f32.gmra.mxu0 %v165_v54 }
  0x47   :  { %1420 = vmatprep.mubr.f32.mxu0 %v166_v55 }
  0x48   :  { %1466 = vmatmul.mubr.f32.gmra.mxu1 %v197_v56 }
  0x49   :  { %1468 = vmatprep.mubr.f32.mxu1 %v198_v57 }
  0x4a   :  { %1421 = vmatmul.mubr.f32.gmra.mxu0 %v167_v58 }
  0x4b   :  { %1423 = vmatprep.mubr.f32.mxu0 %v168_v59 }
  0x4c   :  { %1469 = vmatmul.mubr.f32.gmra.mxu1 %v199_v60 }
  0x4d   :  { %1471 = vmatprep.mubr.f32.mxu1 %v200_v61 }
  0x4e   :  { %1424 = vmatmul.mubr.f32.gmra.mxu0 %v169_v62 }
  0x4f   :  { %1426 = vmatprep.mubr.f32.mxu0 %v170_v63 }
  0x50   :  { %1472 = vmatmul.mubr.f32.gmra.mxu1 %v201_v0 }
  0x51   :  { %1474 = vmatprep.mubr.f32.mxu1 %v202_v1 }
  0x52   :  { %1427 = vmatmul.mubr.f32.gmra.mxu0 %v171_v2 }
  0x53   :  { %1429 = vmatprep.mubr.f32.mxu0 %v172_v3 }
  0x54   :  { %1475 = vmatmul.mubr.f32.gmra.mxu1 %v203_v4 }
  0x55   :  { %1477 = vmatprep.mubr.f32.mxu1 %v204_v5 }
  0x56   :  { %1430 = vmatmul.mubr.f32.gmra.mxu0 %v173_v6 }
  0x57   :  { %1432 = vmatprep.mubr.f32.mxu0 %v174_v7 }
  0x58   :  { %1478 = vmatmul.mubr.f32.gmra.mxu1 %v205_v8 }
  0x59   :  { %1480 = vmatprep.mubr.f32.mxu1 %v206_v9 }
  0x5a   :  { %1433 = vmatmul.mubr.f32.gmra.mxu0 %v175_v10 }
  0x5b   :  { %1435 = vmatprep.mubr.f32.mxu0 %v176_v11 }
  0x5c   :  { %1481 = vmatmul.mubr.f32.gmra.mxu1 %v207_v12 }
  0x5d   :  { %1483 = vmatprep.mubr.f32.mxu1 %v208_v13 }
  0x5e   :  { %1436 = vmatmul.mubr.f32.gmra.mxu0 %v177_v14 }
  0x60   :  { %1484 = vmatmul.mubr.f32.gmra.mxu1 %v209_v15 }
  0xe2   :  { %v1392_v16 = vpop.f32.mrf.mxu0 }
  0xe3   :  { %vm807_vm0 = vcmp.ge.f32.partialorder %v1392_v16, 0.0  ;;  %v871_v19 = vmul.f32 0.1, %v1392_v16 }
  0xe4   :  { %v292_v17 = vpop.f32.mrf.mxu0  ;;  %v1440_v18 = vpop.f32.mrf.mxu1 }
  0xe5   :  { %v935_v22 = vsel %vm807_vm0, %v1392_v16, %v871_v19  ;;  %vm806_vm1 = vcmp.ge.f32.partialorder %v292_v17, 0.0  ;;  %v870_v23 = vmul.f32 0.1, %v292_v17  ;;  %vm839_vm2 = vcmp.ge.f32.partialorder %v1440_v18, 0.0 }
  0xe6   :  { %v1395_v20 = vpop.f32.mrf.mxu0  ;;  %v452_v21 = vpop.f32.mrf.mxu1  ;;  %999 = vst [vmem:[%s2268_s2 + $0x8] sm:$0xff] %v935_v22  ;;  %v903_v25 = vmul.f32 0.1, %v1440_v18  ;;  %v1133_v29 = vmul.f32 %v935_v22, %v935_v22 }
  0xe7   :  { %v934_v27 = vsel %vm806_vm1, %v292_v17, %v870_v23  ;;  %vm809_vm3 = vcmp.ge.f32.partialorder %v1395_v20, 0.0  ;;  %v873_v28 = vmul.f32 0.1, %v1395_v20  ;;  %vm838_vm4 = vcmp.ge.f32.partialorder %v452_v21, 0.0 }
  0xe8   :  { %v302_v24 = vpop.f32.mrf.mxu0  ;;  %v1787_v26 = vpop.f32.mrf.mxu1  ;;  %998 = vst [vmem:[%s2268_s2] sm:$0xff] %v934_v27  ;;  %v1132_v30 = vmul.f32 %v934_v27, %v934_v27  ;;  %v1792_v32 = vsel %vm839_vm2, %v1440_v18, %v903_v25  ;;  %v1062_v36 = vadd.f32 %v935_v22, %v934_v27  ;;  %v902_v39 = vmul.f32 0.1, %v452_v21 }
  0xe9   :  { %v937_v34 = vsel %vm809_vm3, %v1395_v20, %v873_v28  ;;  %vm808_vm5 = vcmp.ge.f32.partialorder %v302_v24, 0.0  ;;  %v872_v35 = vmul.f32 0.1, %v302_v24  ;;  %1031 = vst [vmem:[%s2268_s2 + $0x108] sm:$0xff] %v1792_v32  ;;  %vm841_vm9 = vcmp.ge.f32.partialorder %v1787_v26, 0.0 }
  0xea   :  { %v1398_v31 = vpop.f32.mrf.mxu0  ;;  %v1794_v33 = vpop.f32.mrf.mxu1  ;;  %v1196_v37 = vadd.f32 %v1133_v29, %v1132_v30  ;;  %1001 = vst [vmem:[%s2268_s2 + $0x18] sm:$0xff] %v937_v34  ;;  %v1809_v46 = vsel %vm838_vm4, %v452_v21, %v902_v39  ;;  %v1135_v50 = vmul.f32 %v937_v34, %v937_v34  ;;  %v905_v4 = vmul.f32 0.1, %v1787_v26 }
  0xeb   :  { %v936_v41 = vsel %vm808_vm5, %v302_v24, %v872_v35  ;;  %vm811_vm6 = vcmp.ge.f32.partialorder %v1398_v31, 0.0  ;;  %v875_v42 = vmul.f32 0.1, %v1398_v31  ;;  %1030 = vst [vmem:[%s2268_s2 + $0x100] sm:$0xff] %v1809_v46  ;;  %vm840_vm15 = vcmp.ge.f32.partialorder %v1794_v33, 0.0 }
  0xec   :  { %v312_v38 = vpop.f32.mrf.mxu0  ;;  %v1803_v40 = vpop.f32.mrf.mxu1  ;;  %1000 = vst [vmem:[%s2268_s2 + $0x10] sm:$0xff] %v936_v41  ;;  %v1063_v43 = vadd.f32 %v1062_v36, %v936_v41  ;;  %v1134_v44 = vmul.f32 %v936_v41, %v936_v41  ;;  %v1840_v12 = vsel %vm841_vm9, %v1787_v26, %v905_v4 }
  0xed   :  { %v939_v48 = vsel %vm811_vm6, %v1398_v31, %v875_v42  ;;  %vm810_vm7 = vcmp.ge.f32.partialorder %v312_v38, 0.0  ;;  %v874_v49 = vmul.f32 0.1, %v312_v38  ;;  %1033 = vst [vmem:[%s2268_s2 + $0x118] sm:$0xff] %v1840_v12  ;;  %vm843_vm5 = vcmp.ge.f32.partialorder %v1803_v40, 0.0 }
  0xee   :  { %v1401_v45 = vpop.f32.mrf.mxu0  ;;  %v1811_v47 = vpop.f32.mrf.mxu1  ;;  %v1064_v51 = vadd.f32 %v1063_v43, %v937_v34  ;;  %v1197_v52 = vadd.f32 %v1196_v37, %v1134_v44  ;;  %1003 = vst [vmem:[%s2268_s2 + $0x28] sm:$0xff] %v939_v48  ;;  %v1137_v0 = vmul.f32 %v939_v48, %v939_v48  ;;  %v904_v44 = vmul.f32 0.1, %v1794_v33 }
  0xef   :  { %v938_v55 = vsel %vm810_vm7, %v312_v38, %v874_v49  ;;  %vm813_vm8 = vcmp.ge.f32.partialorder %v1401_v45, 0.0  ;;  %v877_v56 = vmul.f32 0.1, %v1401_v45 }
  0xf0   :  { %v322_v53 = vpop.f32.mrf.mxu0  ;;  %v1820_v54 = vpop.f32.mrf.mxu1  ;;  %v1198_v57 = vadd.f32 %v1197_v52, %v1135_v50  ;;  %1002 = vst [vmem:[%s2268_s2 + $0x20] sm:$0xff] %v938_v55  ;;  %v1065_v58 = vadd.f32 %v1064_v51, %v938_v55  ;;  %v1136_v59 = vmul.f32 %v938_v55, %v938_v55  ;;  %v1876_v55 = vsel %vm840_vm15, %v1794_v33, %v904_v44 }
  0xf1   :  { %v941_v62 = vsel %vm813_vm8, %v1401_v45, %v877_v56  ;;  %vm812_vm10 = vcmp.ge.f32.partialorder %v322_v53, 0.0  ;;  %v876_v63 = vmul.f32 0.1, %v322_v53  ;;  %1032 = vst [vmem:[%s2268_s2 + $0x110] sm:$0xff] %v1876_v55 }
  0xf2   :  { %v1404_v60 = vpop.f32.mrf.mxu0  ;;  %v1826_v61 = vpop.f32.mrf.mxu1  ;;  %v1066_v1 = vadd.f32 %v1065_v58, %v939_v48  ;;  %v1199_v2 = vadd.f32 %v1198_v57, %v1136_v59  ;;  %1005 = vst [vmem:[%s2268_s2 + $0x38] sm:$0xff] %v941_v62  ;;  %v1139_v16 = vmul.f32 %v941_v62, %v941_v62 }
  0xf3   :  { %v940_v6 = vsel %vm812_vm10, %v322_v53, %v876_v63  ;;  %vm815_vm11 = vcmp.ge.f32.partialorder %v1404_v60, 0.0  ;;  %v879_v7 = vmul.f32 0.1, %v1404_v60 }
  0xf4   :  { %v332_v3 = vpop.f32.mrf.mxu0  ;;  %v1832_v5 = vpop.f32.mrf.mxu1  ;;  %v1200_v8 = vadd.f32 %v1199_v2, %v1137_v0  ;;  %1004 = vst [vmem:[%s2268_s2 + $0x30] sm:$0xff] %v940_v6  ;;  %v1067_v9 = vadd.f32 %v1066_v1, %v940_v6  ;;  %v1138_v10 = vmul.f32 %v940_v6, %v940_v6 }
  0xf5   :  { %v943_v14 = vsel %vm815_vm11, %v1404_v60, %v879_v7  ;;  %vm814_vm12 = vcmp.ge.f32.partialorder %v332_v3, 0.0  ;;  %v878_v15 = vmul.f32 0.1, %v332_v3  ;;  %vm842_vm11 = vcmp.ge.f32.partialorder %v1811_v47, 0.0 }
  0xf6   :  { %v1407_v11 = vpop.f32.mrf.mxu0  ;;  %v1842_v13 = vpop.f32.mrf.mxu1  ;;  %v1068_v17 = vadd.f32 %v1067_v9, %v941_v62  ;;  %v1201_v18 = vadd.f32 %v1200_v8, %v1138_v10  ;;  %1007 = vst [vmem:[%s2268_s2 + $0x48] sm:$0xff] %v943_v14  ;;  %v1141_v30 = vmul.f32 %v943_v14, %v943_v14 }
  0xf7   :  { %v942_v21 = vsel %vm814_vm12, %v332_v3, %v878_v15  ;;  %vm817_vm13 = vcmp.ge.f32.partialorder %v1407_v11, 0.0  ;;  %v881_v22 = vmul.f32 0.1, %v1407_v11 }
  0xf8   :  { %v342_v19 = vpop.f32.mrf.mxu0  ;;  %v1851_v20 = vpop.f32.mrf.mxu1  ;;  %v1202_v23 = vadd.f32 %v1201_v18, %v1139_v16  ;;  %1006 = vst [vmem:[%s2268_s2 + $0x40] sm:$0xff] %v942_v21  ;;  %v1069_v24 = vadd.f32 %v1068_v17, %v942_v21  ;;  %v1140_v25 = vmul.f32 %v942_v21, %v942_v21 }
  0xf9   :  { %v945_v28 = vsel %vm817_vm13, %v1407_v11, %v881_v22  ;;  %vm816_vm14 = vcmp.ge.f32.partialorder %v342_v19, 0.0  ;;  %v880_v29 = vmul.f32 0.1, %v342_v19  ;;  %v907_v22 = vmul.f32 0.1, %v1803_v40 }
  0xfa   :  { %v1410_v26 = vpop.f32.mrf.mxu0  ;;  %v1856_v27 = vpop.f32.mrf.mxu1  ;;  %v1070_v31 = vadd.f32 %v1069_v24, %v943_v14  ;;  %v1203_v34 = vadd.f32 %v1202_v23, %v1140_v25  ;;  %1009 = vst [vmem:[%s2268_s2 + $0x58] sm:$0xff] %v945_v28  ;;  %v1143_v50 = vmul.f32 %v945_v28, %v945_v28 }
  0xfb   :  { %v944_v37 = vsel %vm816_vm14, %v342_v19, %v880_v29  ;;  %vm819_vm0 = vcmp.ge.f32.partialorder %v1410_v26, 0.0  ;;  %v883_v38 = vmul.f32 0.1, %v1410_v26 }
  0xfc   :  { %v352_v35 = vpop.f32.mrf.mxu0  ;;  %v1862_v36 = vpop.f32.mrf.mxu1  ;;  %v1204_v39 = vadd.f32 %v1203_v34, %v1141_v30  ;;  %1008 = vst [vmem:[%s2268_s2 + $0x50] sm:$0xff] %v944_v37  ;;  %v1071_v41 = vadd.f32 %v1070_v31, %v944_v37  ;;  %v1142_v42 = vmul.f32 %v944_v37, %v944_v37  ;;  %v1908_v31 = vsel %vm843_vm5, %v1803_v40, %v907_v22 }
  0xfd   :  { %v947_v48 = vsel %vm819_vm0, %v1410_v26, %v883_v38  ;;  %vm818_vm1 = vcmp.ge.f32.partialorder %v352_v35, 0.0  ;;  %v882_v49 = vmul.f32 0.1, %v352_v35  ;;  %1035 = vst [vmem:[%s2268_s2 + $0x128] sm:$0xff] %v1908_v31 }
  0xfe   :  { %v1413_v43 = vpop.f32.mrf.mxu0  ;;  %v1868_v45 = vpop.f32.mrf.mxu1  ;;  %v1205_v51 = vadd.f32 %v1204_v39, %v1142_v42  ;;  %1011 = vst [vmem:[%s2268_s2 + $0x68] sm:$0xff] %v947_v48  ;;  %v1072_v52 = vadd.f32 %v1071_v41, %v945_v28  ;;  %v1145_v1 = vmul.f32 %v947_v48, %v947_v48 }
  0xff   :  { %v946_v56 = vsel %vm818_vm1, %v352_v35, %v882_v49  ;;  %vm821_vm2 = vcmp.ge.f32.partialorder %v1413_v43, 0.0  ;;  %v885_v57 = vmul.f32 0.1, %v1413_v43  ;;  %vm845_vm1 = vcmp.ge.f32.partialorder %v1820_v54, 0.0 }
 0x100   :  { %v362_v53 = vpop.f32.mrf.mxu0  ;;  %v1882_v58 = vpop.f32.mrf.mxu1  ;;  %1010 = vst [vmem:[%s2268_s2 + $0x60] sm:$0xff] %v946_v56  ;;  %v1073_v59 = vadd.f32 %v1072_v52, %v946_v56  ;;  %v1144_v60 = vmul.f32 %v946_v56, %v946_v56  ;;  %v1206_v62 = vadd.f32 %v1205_v51, %v1143_v50 }
 0x101   :  { %v949_v33 = vsel %vm821_vm2, %v1413_v43, %v885_v57  ;;  %vm820_vm3 = vcmp.ge.f32.partialorder %v362_v53, 0.0  ;;  %v884_v0 = vmul.f32 0.1, %v362_v53 }
 0x102   :  { %v1416_v63 = vpop.f32.mrf.mxu0  ;;  %v1207_v2 = vadd.f32 %v1206_v62, %v1144_v60  ;;  %1013 = vst [vmem:[%s2268_s2 + $0x78] sm:$0xff] %v949_v33  ;;  %v1074_v3 = vadd.f32 %v1073_v59, %v947_v48  ;;  %v1890_v8 = vpop.f32.mrf.mxu1  ;;  %v1147_v17 = vmul.f32 %v949_v33, %v949_v33 }
 0x103   :  { %v948_v6 = vsel %vm820_vm3, %v362_v53, %v884_v0  ;;  %vm823_vm4 = vcmp.ge.f32.partialorder %v1416_v63, 0.0  ;;  %v887_v7 = vmul.f32 0.1, %v1416_v63 }
 0x104   :  { %v372_v4 = vpop.f32.mrf.mxu0  ;;  %1012 = vst [vmem:[%s2268_s2 + $0x70] sm:$0xff] %v948_v6  ;;  %v1075_v9 = vadd.f32 %v1074_v3, %v948_v6  ;;  %v1146_v10 = vmul.f32 %v948_v6, %v948_v6  ;;  %v1208_v11 = vadd.f32 %v1207_v2, %v1145_v1  ;;  %v1900_v25 = vpop.f32.mrf.mxu1  ;;  %v906_v3 = vmul.f32 0.1, %v1811_v47 }
 0x105   :  { %v951_v15 = vsel %vm823_vm4, %v1416_v63, %v887_v7  ;;  %vm822_vm6 = vcmp.ge.f32.partialorder %v372_v4, 0.0  ;;  %v886_v16 = vmul.f32 0.1, %v372_v4 }
 0x106   :  { %v1419_v14 = vpop.f32.mrf.mxu0  ;;  %v1209_v18 = vadd.f32 %v1208_v11, %v1146_v10  ;;  %1015 = vst [vmem:[%s2268_s2 + $0x88] sm:$0xff] %v951_v15  ;;  %v1076_v19 = vadd.f32 %v1075_v9, %v949_v33  ;;  %v1149_v37 = vmul.f32 %v951_v15, %v951_v15  ;;  %v1917_v43 = vpop.f32.mrf.mxu1 }
 0x107   :  { %v950_v23 = vsel %vm822_vm6, %v372_v4, %v886_v16  ;;  %vm825_vm7 = vcmp.ge.f32.partialorder %v1419_v14, 0.0  ;;  %v889_v24 = vmul.f32 0.1, %v1419_v14 }
 0x108   :  { %v382_v21 = vpop.f32.mrf.mxu0  ;;  %1014 = vst [vmem:[%s2268_s2 + $0x80] sm:$0xff] %v950_v23  ;;  %v1077_v26 = vadd.f32 %v1076_v19, %v950_v23  ;;  %v1148_v28 = vmul.f32 %v950_v23, %v950_v23  ;;  %v1210_v29 = vadd.f32 %v1209_v18, %v1147_v17  ;;  %v1926_v63 = vpop.f32.mrf.mxu1 }
 0x109   :  { %v953_v34 = vsel %vm825_vm7, %v1419_v14, %v889_v24  ;;  %vm824_vm8 = vcmp.ge.f32.partialorder %v382_v21, 0.0  ;;  %v888_v35 = vmul.f32 0.1, %v382_v21  ;;  %v1938_v14 = vsel %vm842_vm11, %v1811_v47, %v906_v3 }
 0x10a   :  { %v1422_v30 = vpop.f32.mrf.mxu0  ;;  %v1211_v38 = vadd.f32 %v1210_v29, %v1148_v28  ;;  %1017 = vst [vmem:[%s2268_s2 + $0x98] sm:$0xff] %v953_v34  ;;  %v1078_v39 = vadd.f32 %v1077_v26, %v951_v15  ;;  %v1151_v53 = vmul.f32 %v953_v34, %v953_v34  ;;  %1034 = vst [vmem:[%s2268_s2 + $0x120] sm:$0xff] %v1938_v14  ;;  %v1944_v17 = vpop.f32.mrf.mxu1  ;;  %vm844_vm7 = vcmp.ge.f32.partialorder %v1826_v61, 0.0 }
 0x10b   :  { %v952_v42 = vsel %vm824_vm8, %v382_v21, %v888_v35  ;;  %vm827_vm9 = vcmp.ge.f32.partialorder %v1422_v30, 0.0  ;;  %v891_v40 = vmul.f32 0.1, %v1422_v30  ;;  %vm847_vm8 = vcmp.ge.f32.partialorder %v1832_v5, 0.0 }
 0x10c   :  { %v392_v41 = vpop.f32.mrf.mxu0  ;;  %1016 = vst [vmem:[%s2268_s2 + $0x90] sm:$0xff] %v952_v42  ;;  %v1079_v44 = vadd.f32 %v1078_v39, %v952_v42  ;;  %v1150_v48 = vmul.f32 %v952_v42, %v952_v42  ;;  %v1212_v49 = vadd.f32 %v1211_v38, %v1149_v37  ;;  %v1952_v35 = vpop.f32.mrf.mxu1  ;;  %vm848_vm11 = vcmp.ge.f32.partialorder %v1856_v27, 0.0 }
 0x10d   :  { %v955_v51 = vsel %vm827_vm9, %v1422_v30, %v891_v40  ;;  %vm826_vm10 = vcmp.ge.f32.partialorder %v392_v41, 0.0  ;;  %v890_v52 = vmul.f32 0.1, %v392_v41  ;;  %vm846_vm9 = vcmp.ge.f32.partialorder %v1842_v13, 0.0 }
 0x10e   :  { %v1425_v50 = vpop.f32.mrf.mxu0  ;;  %v1213_v56 = vadd.f32 %v1212_v49, %v1150_v48  ;;  %1019 = vst [vmem:[%s2268_s2 + $0xa8] sm:$0xff] %v955_v51  ;;  %v1080_v57 = vadd.f32 %v1079_v44, %v953_v34  ;;  %v1153_v7 = vmul.f32 %v955_v51, %v955_v51 }
 0x10f   :  { %v954_v60 = vsel %vm826_vm10, %v392_v41, %v890_v52  ;;  %vm829_vm12 = vcmp.ge.f32.partialorder %v1425_v50, 0.0  ;;  %v893_v62 = vmul.f32 0.1, %v1425_v50  ;;  %vm849_vm10 = vcmp.ge.f32.partialorder %v1851_v20, 0.0 }
 0x110   :  { %v402_v59 = vpop.f32.mrf.mxu0  ;;  %1018 = vst [vmem:[%s2268_s2 + $0xa0] sm:$0xff] %v954_v60  ;;  %v1081_v33 = vadd.f32 %v1080_v57, %v954_v60  ;;  %v1152_v0 = vmul.f32 %v954_v60, %v954_v60  ;;  %v1214_v1 = vadd.f32 %v1213_v56, %v1151_v53  ;;  %v1962_v56 = vpop.f32.mrf.mxu1 }
 0x111   :  { %v957_v4 = vsel %vm829_vm12, %v1425_v50, %v893_v62  ;;  %vm828_vm13 = vcmp.ge.f32.partialorder %v402_v59, 0.0  ;;  %v892_v6 = vmul.f32 0.1, %v402_v59  ;;  %vm851_vm12 = vcmp.ge.f32.partialorder %v1862_v36, 0.0 }
 0x112   :  { %v1428_v2 = vpop.f32.mrf.mxu0  ;;  %v1215_v9 = vadd.f32 %v1214_v1, %v1152_v0  ;;  %1021 = vst [vmem:[%s2268_s2 + $0xb8] sm:$0xff] %v957_v4  ;;  %v1082_v10 = vadd.f32 %v1081_v33, %v955_v51  ;;  %v1155_v24 = vmul.f32 %v957_v4, %v957_v4  ;;  %v909_v51 = vmul.f32 0.1, %v1820_v54 }
 0x113   :  { %v956_v15 = vsel %vm828_vm13, %v402_v59, %v892_v6  ;;  %vm831_vm14 = vcmp.ge.f32.partialorder %v1428_v2, 0.0  ;;  %v895_v16 = vmul.f32 0.1, %v1428_v2  ;;  %vm850_vm13 = vcmp.ge.f32.partialorder %v1868_v45, 0.0 }
 0x114   :  { %v412_v11 = vpop.f32.mrf.mxu0  ;;  %1020 = vst [vmem:[%s2268_s2 + $0xb0] sm:$0xff] %v956_v15  ;;  %v1083_v18 = vadd.f32 %v1082_v10, %v956_v15  ;;  %v1154_v19 = vmul.f32 %v956_v15, %v956_v15  ;;  %v1216_v21 = vadd.f32 %v1215_v9, %v1153_v7  ;;  %v1970_v33 = vsel %vm845_vm1, %v1820_v54, %v909_v51  ;;  %v1979_v9 = vpop.f32.mrf.mxu1 }
 0x115   :  { %v959_v47 = vsel %vm831_vm14, %v1428_v2, %v895_v16  ;;  %vm830_vm15 = vcmp.ge.f32.partialorder %v412_v11, 0.0  ;;  %v894_v23 = vmul.f32 0.1, %v412_v11  ;;  %1037 = vst [vmem:[%s2268_s2 + $0x138] sm:$0xff] %v1970_v33  ;;  %vm853_vm14 = vcmp.ge.f32.partialorder %v1882_v58, 0.0 }
 0x116   :  { %v1431_v22 = vpop.f32.mrf.mxu0  ;;  %v1217_v26 = vadd.f32 %v1216_v21, %v1154_v19  ;;  %1023 = vst [vmem:[%s2268_s2 + $0xc8] sm:$0xff] %v959_v47  ;;  %v1084_v28 = vadd.f32 %v1083_v18, %v957_v4  ;;  %v1157_v44 = vmul.f32 %v959_v47, %v959_v47  ;;  %vm854_vm1 = vcmp.ge.f32.partialorder %v1917_v43, 0.0 }
 0x117   :  { %v958_v30 = vsel %vm830_vm15, %v412_v11, %v894_v23  ;;  %vm833_vm0 = vcmp.ge.f32.partialorder %v1431_v22, 0.0  ;;  %v897_v34 = vmul.f32 0.1, %v1431_v22  ;;  %v908_v23 = vmul.f32 0.1, %v1826_v61 }
 0x118   :  { %v422_v29 = vpop.f32.mrf.mxu0  ;;  %1022 = vst [vmem:[%s2268_s2 + $0xc0] sm:$0xff] %v958_v30  ;;  %v1085_v37 = vadd.f32 %v1084_v28, %v958_v30  ;;  %v1156_v38 = vmul.f32 %v958_v30, %v958_v30  ;;  %v1218_v39 = vadd.f32 %v1217_v26, %v1155_v24  ;;  %v911_v24 = vmul.f32 0.1, %v1832_v5  ;;  %v1991_v26 = vpop.f32.mrf.mxu1 }
 0x119   :  { %v961_v42 = vsel %vm833_vm0, %v1431_v22, %v897_v34  ;;  %vm832_vm2 = vcmp.ge.f32.partialorder %v422_v29, 0.0  ;;  %v896_v40 = vmul.f32 0.1, %v422_v29  ;;  %v972_v34 = vsel %vm844_vm7, %v1826_v61, %v908_v23 }
 0x11a   :  { %v1434_v41 = vpop.f32.mrf.mxu0  ;;  %v1219_v48 = vadd.f32 %v1218_v39, %v1156_v38  ;;  %1025 = vst [vmem:[%s2268_s2 + $0xd8] sm:$0xff] %v961_v42  ;;  %v1086_v49 = vadd.f32 %v1085_v37, %v959_v47  ;;  %v1159_v2 = vmul.f32 %v961_v42, %v961_v42  ;;  %v1998_v37 = vsel %vm847_vm8, %v1832_v5, %v911_v24 }
 0x11b   :  { %v960_v52 = vsel %vm832_vm2, %v422_v29, %v896_v40  ;;  %vm835_vm3 = vcmp.ge.f32.partialorder %v1434_v41, 0.0  ;;  %v899_v53 = vmul.f32 0.1, %v1434_v41  ;;  %1036 = vst [vmem:[%s2268_s2 + $0x130] sm:$0xff] %v972_v34  ;;  %1039 = vst [vmem:[%s2268_s2 + $0x148] sm:$0xff] %v1998_v37  ;;  %v2013_v40 = vpop.f32.mrf.mxu1  ;;  %vm852_vm15 = vcmp.ge.f32.partialorder %v1890_v8, 0.0 }
 0x11c   :  { %v432_v50 = vpop.f32.mrf.mxu0  ;;  %1024 = vst [vmem:[%s2268_s2 + $0xd0] sm:$0xff] %v960_v52  ;;  %v1087_v57 = vadd.f32 %v1086_v49, %v960_v52  ;;  %v1158_v59 = vmul.f32 %v960_v52, %v960_v52  ;;  %v1220_v60 = vadd.f32 %v1219_v48, %v1157_v44  ;;  %v910_v61 = vmul.f32 0.1, %v1842_v13 }
 0x11d   :  { %v963_v0 = vsel %vm835_vm3, %v1434_v41, %v899_v53  ;;  %vm834_vm4 = vcmp.ge.f32.partialorder %v432_v50, 0.0  ;;  %v898_v1 = vmul.f32 0.1, %v432_v50  ;;  %v913_v5 = vmul.f32 0.1, %v1851_v20 }
 0x11e   :  { %v1437_v62 = vpop.f32.mrf.mxu0  ;;  %v1221_v3 = vadd.f32 %v1220_v60, %v1158_v59  ;;  %1027 = vst [vmem:[%s2268_s2 + $0xe8] sm:$0xff] %v963_v0  ;;  %v1088_v4 = vadd.f32 %v1087_v57, %v961_v42  ;;  %v1161_v19 = vmul.f32 %v963_v0, %v963_v0  ;;  %v1164_v42 = vmul.f32 %v1809_v46, %v1809_v46 }
 0x11f   :  { %v962_v7 = vsel %vm834_vm4, %v432_v50, %v898_v1  ;;  %vm837_vm5 = vcmp.ge.f32.partialorder %v1437_v62, 0.0  ;;  %v901_v54 = vmul.f32 0.1, %v1437_v62  ;;  %v912_v49 = vmul.f32 0.1, %v1856_v27 }
 0x120   :  { %v442_v6 = vpop.f32.mrf.mxu0  ;;  %1026 = vst [vmem:[%s2268_s2 + $0xe0] sm:$0xff] %v962_v7  ;;  %v1089_v10 = vadd.f32 %v1088_v4, %v962_v7  ;;  %v1160_v11 = vmul.f32 %v962_v7, %v962_v7  ;;  %v1222_v15 = vadd.f32 %v1221_v3, %v1159_v2  ;;  %v974_v50 = vsel %vm846_vm9, %v1842_v13, %v910_v61 }
 0x121   :  { %v965_v16 = vsel %vm837_vm5, %v1437_v62, %v901_v54  ;;  %vm836_vm6 = vcmp.ge.f32.partialorder %v442_v6, 0.0  ;;  %v900_v18 = vmul.f32 0.1, %v442_v6  ;;  %v2020_v51 = vsel %vm849_vm10, %v1851_v20, %v913_v5  ;;  %1038 = vst [vmem:[%s2268_s2 + $0x140] sm:$0xff] %v974_v50  ;;  %v2038_v20 = vpop.f32.mrf.mxu1 }
 0x122   :  { %v1223_v21 = vadd.f32 %v1222_v15, %v1160_v11  ;;  %1029 = vst [vmem:[%s2268_s2 + $0xf8] sm:$0xff] %v965_v16  ;;  %v1090_v22 = vadd.f32 %v1089_v10, %v963_v0  ;;  %v1163_v38 = vmul.f32 %v965_v16, %v965_v16  ;;  %v1165_v52 = vmul.f32 %v1792_v32, %v1792_v32 }
 0x123   :  { %v964_v47 = vsel %vm836_vm6, %v442_v6, %v900_v18  ;;  %1041 = vst [vmem:[%s2268_s2 + $0x158] sm:$0xff] %v2020_v51  ;;  %v915_v13 = vmul.f32 0.1, %v1862_v36  ;;  %v1166_v59 = vmul.f32 %v1876_v55, %v1876_v55  ;;  %v1167_v0 = vmul.f32 %v1840_v12, %v1840_v12 }
 0x124   :  { %1028 = vst [vmem:[%s2268_s2 + $0xf0] sm:$0xff] %v964_v47  ;;  %v1091_v28 = vadd.f32 %v1090_v22, %v964_v47  ;;  %v1162_v29 = vmul.f32 %v964_v47, %v964_v47  ;;  %v1224_v30 = vadd.f32 %v1223_v21, %v1161_v19  ;;  %v1168_v3 = vmul.f32 %v1938_v14, %v1938_v14 }
 0x125   :  { %v2049_v62 = vsel %vm851_vm12, %v1862_v36, %v915_v13  ;;  %v2070_v36 = vpop.f32.mrf.mxu1  ;;  %v916_v6 = vmul.f32 0.1, %v1890_v8  ;;  %vm855_vm0 = vcmp.ge.f32.partialorder %v1900_v25, 0.0  ;;  %v919_v54 = vmul.f32 0.1, %v1900_v25 }
 0x126   :  { %v1225_v39 = vadd.f32 %v1224_v30, %v1162_v29  ;;  %v1092_v41 = vadd.f32 %v1091_v28, %v965_v16  ;;  %1043 = vst [vmem:[%s2268_s2 + $0x168] sm:$0xff] %v2049_v62  ;;  %v1169_v10 = vmul.f32 %v1908_v31, %v1908_v31  ;;  %v1170_v19 = vmul.f32 %v972_v34, %v972_v34 }
 0x127   :  { %v2098_v16 = vpop.f32.mrf.mxu1  ;;  %vm857_vm2 = vcmp.ge.f32.partialorder %v1926_v63, 0.0  ;;  %v1171_v22 = vmul.f32 %v1970_v33, %v1970_v33  ;;  %vm856_vm3 = vcmp.ge.f32.partialorder %v1944_v17, 0.0  ;;  %vm859_vm4 = vcmp.ge.f32.partialorder %v1952_v35, 0.0 }
 0x128   :  { %v1093_v44 = vadd.f32 %v1092_v41, %v1809_v46  ;;  %v1226_v48 = vadd.f32 %v1225_v39, %v1163_v38  ;;  %v2033_v46 = vsel %vm848_vm11, %v1856_v27, %v912_v49  ;;  %v914_v27 = vmul.f32 0.1, %v1868_v45 }
 0x129   :  { %1040 = vst [vmem:[%s2268_s2 + $0x150] sm:$0xff] %v2033_v46  ;;  %v2122_v28 = vpop.f32.mrf.mxu1  ;;  %v1172_v30 = vmul.f32 %v974_v50, %v974_v50  ;;  %vm858_vm5 = vcmp.ge.f32.partialorder %v1962_v56, 0.0  ;;  %v922_v38 = vmul.f32 0.1, %v1962_v56  ;;  %v1173_v39 = vmul.f32 %v1998_v37, %v1998_v37 }
 0x12a   :  { %v1227_v53 = vadd.f32 %v1226_v48, %v1164_v42  ;;  %v1094_v57 = vadd.f32 %v1093_v44, %v1792_v32  ;;  %vm861_vm6 = vcmp.ge.f32.partialorder %v1979_v9, 0.0  ;;  %vm860_vm7 = vcmp.ge.f32.partialorder %v1991_v26, 0.0 }
 0x12b   :  { %v2151_v5 = vsel %vm858_vm5, %v1962_v56, %v922_v38  ;;  %v592_v44 = vpop.f32.mrf.mxu1  ;;  %vm863_vm8 = vcmp.ge.f32.partialorder %v2013_v40, 0.0  ;;  %vm862_vm9 = vcmp.ge.f32.partialorder %v2038_v20, 0.0  ;;  %vm865_vm10 = vcmp.ge.f32.partialorder %v2070_v36, 0.0 }
 0x12c   :  { %v1095_v32 = vadd.f32 %v1094_v57, %v1876_v55  ;;  %v1228_v60 = vadd.f32 %v1227_v53, %v1165_v52  ;;  %v2059_v55 = vsel %vm850_vm13, %v1868_v45, %v914_v27  ;;  %1050 = vst [vmem:[%s2268_s2 + $0x1a0] sm:$0xff] %v2151_v5  ;;  %v924_v57 = vmul.f32 0.1, %v1991_v26 }
 0x12d   :  { %1042 = vst [vmem:[%s2268_s2 + $0x160] sm:$0xff] %v2059_v55  ;;  %v1176_v53 = vmul.f32 %v2059_v55, %v2059_v55  ;;  %v929_v27 = vmul.f32 0.1, %v2070_v36  ;;  %vm864_vm11 = vcmp.ge.f32.partialorder %v2098_v16, 0.0  ;;  %vm867_vm12 = vcmp.ge.f32.partialorder %v2122_v28, 0.0 }
 0x12e   :  { %v1229_v1 = vadd.f32 %v1228_v60, %v1166_v59  ;;  %v1096_v2 = vadd.f32 %v1095_v32, %v1840_v12  ;;  %v917_v12 = vmul.f32 0.1, %v1882_v58  ;;  %v926_v32 = vmul.f32 0.1, %v2038_v20 }
 0x12f   :  { %v988_v59 = vsel %vm860_vm7, %v1991_v26, %v924_v57  ;;  %vm866_vm13 = vcmp.ge.f32.partialorder %v592_v44, 0.0 }
 0x130   :  { %v1097_v4 = vadd.f32 %v1096_v2, %v1938_v14  ;;  %v1230_v45 = vadd.f32 %v1229_v1, %v1167_v0  ;;  %v2076_v7 = vsel %vm853_vm14, %v1882_v58, %v917_v12  ;;  %v2087_v14 = vsel %vm852_vm15, %v1890_v8, %v916_v6  ;;  %1052 = vst [vmem:[%s2268_s2 + $0x1b0] sm:$0xff] %v988_v59 }
 0x131   :  { %1045 = vst [vmem:[%s2268_s2 + $0x178] sm:$0xff] %v2076_v7  ;;  %1044 = vst [vmem:[%s2268_s2 + $0x170] sm:$0xff] %v2087_v14  ;;  %v2094_v58 = vsel %vm855_vm0, %v1900_v25, %v919_v54  ;;  %v921_v25 = vmul.f32 0.1, %v1926_v63  ;;  %v1177_v0 = vmul.f32 %v2049_v62, %v2049_v62  ;;  %v990_v26 = vsel %vm862_vm9, %v2038_v20, %v926_v32 }
 0x132   :  { %v1231_v11 = vadd.f32 %v1230_v45, %v1168_v3  ;;  %v1098_v15 = vadd.f32 %v1097_v4, %v1908_v31  ;;  %v918_v31 = vmul.f32 0.1, %v1917_v43  ;;  %1047 = vst [vmem:[%s2268_s2 + $0x188] sm:$0xff] %v2094_v58  ;;  %v1178_v4 = vmul.f32 %v2087_v14, %v2087_v14  ;;  %1054 = vst [vmem:[%s2268_s2 + $0x1c0] sm:$0xff] %v990_v26 }
 0x133   :  { %v2117_v24 = vsel %vm857_vm2, %v1926_v63, %v921_v25 }
 0x134   :  { %v1099_v18 = vadd.f32 %v1098_v15, %v972_v34  ;;  %v1232_v21 = vadd.f32 %v1231_v11, %v1169_v10  ;;  %v2106_v8 = vsel %vm854_vm1, %v1917_v43, %v918_v31  ;;  %v920_v43 = vmul.f32 0.1, %v1944_v17  ;;  %1049 = vst [vmem:[%s2268_s2 + $0x198] sm:$0xff] %v2117_v24 }
 0x135   :  { %1046 = vst [vmem:[%s2268_s2 + $0x180] sm:$0xff] %v2106_v8  ;;  %v1180_v54 = vmul.f32 %v2106_v8, %v2106_v8  ;;  %v931_v10 = vmul.f32 0.1, %v2122_v28  ;;  %v930_v11 = vmul.f32 0.1, %v592_v44 }
 0x136   :  { %v1233_v47 = vadd.f32 %v1232_v21, %v1170_v19  ;;  %v1100_v23 = vadd.f32 %v1099_v18, %v1970_v33  ;;  %v923_v33 = vmul.f32 0.1, %v1952_v35  ;;  %v2130_v63 = vsel %vm856_vm3, %v1944_v17, %v920_v43 }
 0x137   :  { %1048 = vst [vmem:[%s2268_s2 + $0x190] sm:$0xff] %v2130_v63  ;;  %v1175_v17 = vmul.f32 %v2020_v51, %v2020_v51  ;;  %v1181_v19 = vmul.f32 %v2094_v58, %v2094_v58 }
 0x138   :  { %v1101_v29 = vadd.f32 %v1100_v23, %v974_v50  ;;  %v1234_v34 = vadd.f32 %v1233_v47, %v1171_v22  ;;  %v2142_v61 = vsel %vm859_vm4, %v1952_v35, %v923_v33  ;;  %v1174_v35 = vmul.f32 %v2033_v46, %v2033_v46 }
 0x139   :  { %1051 = vst [vmem:[%s2268_s2 + $0x1a8] sm:$0xff] %v2142_v61  ;;  %v1182_v23 = vmul.f32 %v2130_v63, %v2130_v63 }
 0x13a   :  { %v1235_v41 = vadd.f32 %v1234_v34, %v1172_v30  ;;  %v1102_v42 = vadd.f32 %v1101_v29, %v1998_v37  ;;  %v925_v37 = vmul.f32 0.1, %v1979_v9  ;;  %v1184_v34 = vmul.f32 %v2151_v5, %v2151_v5 }
 0x13c   :  { %v1103_v48 = vadd.f32 %v1102_v42, %v2033_v46  ;;  %v1236_v49 = vadd.f32 %v1235_v41, %v1173_v39  ;;  %v2163_v50 = vsel %vm861_vm6, %v1979_v9, %v925_v37  ;;  %v927_v9 = vmul.f32 0.1, %v2013_v40  ;;  %v1485_v46 = vpop.f32.mrf.mxu1 }
 0x13d   :  { %1053 = vst [vmem:[%s2268_s2 + $0x1b8] sm:$0xff] %v2163_v50  ;;  %vm869_vm14 = vcmp.ge.f32.partialorder %v1485_v46, 0.0  ;;  %v933_v31 = vmul.f32 0.1, %v1485_v46  ;;  %v1186_v42 = vmul.f32 %v988_v59, %v988_v59  ;;  %v1187_v37 = vmul.f32 %v2163_v50, %v2163_v50 }
 0x13e   :  { %v1237_v56 = vadd.f32 %v1236_v49, %v1174_v35  ;;  %v1104_v52 = vadd.f32 %v1103_v48, %v2020_v51  ;;  %v2182_v60 = vsel %vm863_vm8, %v2013_v40, %v927_v9  ;;  %v2197_v40 = vsel %vm865_vm10, %v2070_v36, %v929_v27  ;;  %v602_v3 = vpop.f32.mrf.mxu1 }
 0x13f   :  { %1055 = vst [vmem:[%s2268_s2 + $0x1c8] sm:$0xff] %v2182_v60  ;;  %1057 = vst [vmem:[%s2268_s2 + $0x1d8] sm:$0xff] %v2197_v40  ;;  %vm868_vm15 = vcmp.ge.f32.partialorder %v602_v3, 0.0  ;;  %v932_v18 = vmul.f32 0.1, %v602_v3  ;;  %v1188_v35 = vmul.f32 %v990_v26, %v990_v26  ;;  %v1191_v9 = vmul.f32 %v2197_v40, %v2197_v40 }
 0x140   :  { %v1105_v51 = vadd.f32 %v1104_v52, %v2059_v55  ;;  %v1238_v13 = vadd.f32 %v1237_v56, %v1175_v17  ;;  %v928_v55 = vmul.f32 0.1, %v2098_v16 }
 0x141   :  { %v996_v22 = vsel %vm868_vm15, %v602_v3, %v932_v18 }
 0x142   :  { %v1239_v1 = vadd.f32 %v1238_v13, %v1176_v53  ;;  %v1106_v2 = vadd.f32 %v1105_v51, %v2049_v62  ;;  %v1179_v62 = vmul.f32 %v2076_v7, %v2076_v7  ;;  %v992_v20 = vsel %vm864_vm11, %v2098_v16, %v928_v55  ;;  %1060 = vst [vmem:[%s2268_s2 + $0x1f0] sm:$0xff] %v996_v22 }
 0x143   :  { %1056 = vst [vmem:[%s2268_s2 + $0x1d0] sm:$0xff] %v992_v20  ;;  %v994_v16 = vsel %vm866_vm13, %v592_v44, %v930_v11 }
 0x144   :  { %v1107_v12 = vadd.f32 %v1106_v2, %v2087_v14  ;;  %v1240_v45 = vadd.f32 %v1239_v1, %v1177_v0  ;;  %1058 = vst [vmem:[%s2268_s2 + $0x1e0] sm:$0xff] %v994_v16  ;;  %v1194_v2 = vmul.f32 %v996_v22, %v996_v22 }
 0x146   :  { %v1241_v36 = vadd.f32 %v1240_v45, %v1178_v4  ;;  %v1108_v6 = vadd.f32 %v1107_v12, %v2076_v7  ;;  %v995_v7 = vsel %vm867_vm12, %v2122_v28, %v931_v10 }
 0x147   :  { %1059 = vst [vmem:[%s2268_s2 + $0x1e8] sm:$0xff] %v995_v7 }
 0x148   :  { %v1109_v15 = vadd.f32 %v1108_v6, %v2106_v8  ;;  %v1242_v14 = vadd.f32 %v1241_v36, %v1179_v62  ;;  %v997_v8 = vsel %vm869_vm14, %v1485_v46, %v933_v31 }
 0x149   :  { %1061 = vst [vmem:[%s2268_s2 + $0x1f8] sm:$0xff] %v997_v8  ;;  %v1195_v55 = vmul.f32 %v997_v8, %v997_v8 }
 0x14a   :  { %v1243_v21 = vadd.f32 %v1242_v14, %v1180_v54  ;;  %v1110_v25 = vadd.f32 %v1109_v15, %v2094_v58  ;;  %v1183_v58 = vmul.f32 %v2117_v24, %v2117_v24 }
 0x14c   :  { %v1111_v47 = vadd.f32 %v1110_v25, %v2130_v63  ;;  %v1244_v43 = vadd.f32 %v1243_v21, %v1181_v19  ;;  %v1185_v63 = vmul.f32 %v2142_v61, %v2142_v61 }
 0x14e   :  { %v1245_v28 = vadd.f32 %v1244_v43, %v1182_v23  ;;  %v1112_v29 = vadd.f32 %v1111_v47, %v2117_v24 }
 0x150   :  { %v1113_v30 = vadd.f32 %v1112_v29, %v2151_v5  ;;  %v1246_v33 = vadd.f32 %v1245_v28, %v1183_v58  ;;  %v1189_v5 = vmul.f32 %v2182_v60, %v2182_v60 }
 0x152   :  { %v1247_v38 = vadd.f32 %v1246_v33, %v1184_v34  ;;  %v1114_v39 = vadd.f32 %v1113_v30, %v2142_v61  ;;  %v1190_v61 = vmul.f32 %v992_v20, %v992_v20 }
 0x154   :  { %v1115_v41 = vadd.f32 %v1114_v39, %v988_v59  ;;  %v1248_v17 = vadd.f32 %v1247_v38, %v1185_v63  ;;  %v1193_v59 = vmul.f32 %v995_v7, %v995_v7 }
 0x156   :  { %v1249_v44 = vadd.f32 %v1248_v17, %v1186_v42  ;;  %v1116_v24 = vadd.f32 %v1115_v41, %v2163_v50  ;;  %v1192_v50 = vmul.f32 %v994_v16, %v994_v16 }
 0x158   :  { %v1117_v48 = vadd.f32 %v1116_v24, %v990_v26  ;;  %v1250_v49 = vadd.f32 %v1249_v44, %v1187_v37 }
 0x15a   :  { %v1251_v56 = vadd.f32 %v1250_v49, %v1188_v35  ;;  %v1118_v52 = vadd.f32 %v1117_v48, %v2182_v60 }
 0x15c   :  { %v1119_v53 = vadd.f32 %v1118_v52, %v992_v20  ;;  %v1252_v57 = vadd.f32 %v1251_v56, %v1189_v5 }
 0x15e   :  { %v1253_v46 = vadd.f32 %v1252_v57, %v1190_v61  ;;  %v1120_v51 = vadd.f32 %v1119_v53, %v2197_v40 }
 0x160   :  { %v1121_v13 = vadd.f32 %v1120_v51, %v994_v16  ;;  %v1254_v32 = vadd.f32 %v1253_v46, %v1191_v9 }
 0x162   :  { %v1255_v27 = vadd.f32 %v1254_v32, %v1192_v50  ;;  %v1122_v0 = vadd.f32 %v1121_v13, %v995_v7 }
 0x164   :  { %v1123_v1 = vadd.f32 %v1122_v0, %v996_v22  ;;  %v1256_v26 = vadd.f32 %v1255_v27, %v1193_v59 }
 0x166   :  { %v1124_v60 = vadd.f32 %v1123_v1, %v997_v8  ;;  %v1257_v3 = vadd.f32 %v1256_v26, %v1194_v2 }
 0x168   :  { %v1125_v62 = vrot.slane %v1124_v60, 4  ;;  %v1258_v12 = vadd.f32 %v1257_v3, %v1195_v55 }
 0x16a   :  { %v1126_v4 = vadd.f32 %v1125_v62, %v1124_v60  ;;  %v1259_v45 = vrot.slane %v1258_v12, 4 }
 0x16c   :  { %v1127_v20 = vrot.slane %v1126_v4, 2  ;;  %v1260_v36 = vadd.f32 %v1259_v45, %v1258_v12 }
 0x16e   :  { %v1128_v6 = vadd.f32 %v1127_v20, %v1126_v4  ;;  %v1261_v40 = vrot.slane %v1260_v36, 2 }
 0x170   :  { %v1129_v54 = vrot.slane %v1128_v6, 1  ;;  %v1262_v10 = vadd.f32 %v1261_v40, %v1260_v36 }
 0x172   :  { %v1130_v11 = vadd.f32 %v1129_v54, %v1128_v6  ;;  %v1263_v15 = vrot.slane %v1262_v10, 1 }
 0x174   :  { %1131 = vst [vmem:[%s2269_s3] sm:$0x1] %v1130_v11  ;;  %v1264_v14 = vadd.f32 %v1263_v15, %v1262_v10 }
 0x176   :  { %1265 = vst [vmem:[%s2270_s4] sm:$0x1] %v1264_v14 }

// kernel: darknet_block_forward.15
= control target key start
LH: loop header
LB: loop body
LE: loop exit
PB: predicated region body
PF: predicated region fallthrough
CT: control target
= control target key end

     0   :  { %s1160_s0 = inlined_call_operand.vmem [shape: f32[512,128], index: 0, kind: input, shape index: {}]   ;;  %s1161_s1 = inlined_call_operand.vmem [shape: f32[1,128], index: 1, kind: input, shape index: {}]   ;;  %s1162_s2 = inlined_call_operand.vmem [shape: f32[1,128], index: 2, kind: input, shape index: {}]   ;;  %s1163_s3 = inlined_call_operand.vmem [shape: f32[512,128], index: 3, kind: input, shape index: {}]   ;;  %s1164_s4 = inlined_call_operand.vmem [shape: f32[512,128], index: 4, kind: output, shape index: {}]  }
   0x1   :  { %v17_v0 = vld [vmem:[%s1160_s0] sm:$0xff]  ;;  %v18_v4 = vld [vmem:[%s1160_s0 + $0x8] sm:$0xff]  ;;  %v19_v7 = vld [vmem:[%s1160_s0 + $0x10] sm:$0xff] }
   0x2   :  { %v452_v1 = vld [vmem:[%s1161_s1] ss:$0 sm:$0xff]  ;;  %v20_v8 = vld [vmem:[%s1160_s0 + $0x18] sm:$0xff]  ;;  %v224_v10 = vld [vmem:[%s1163_s3 + $0x8] sm:$0xff] }
   0x3   :  { %v457_v2 = vld [vmem:[%s1162_s2] ss:$0 sm:$0xff]  ;;  %v88_v3 = vmul.f32 %v452_v1, %v17_v0  ;;  %v89_v6 = vmul.f32 %v452_v1, %v18_v4  ;;  %v90_v11 = vmul.f32 %v452_v1, %v19_v7  ;;  %v225_v12 = vld [vmem:[%s1163_s3 + $0x10] sm:$0xff]  ;;  %v91_v13 = vmul.f32 %v452_v1, %v20_v8  ;;  %v226_v16 = vld [vmem:[%s1163_s3 + $0x18] sm:$0xff] }
   0x4   :  { %v223_v5 = vld [vmem:[%s1163_s3] sm:$0xff]  ;;  %v22_v18 = vld [vmem:[%s1160_s0 + $0x28] sm:$0xff]  ;;  %v23_v19 = vld [vmem:[%s1160_s0 + $0x30] sm:$0xff] }
   0x5   :  { %v159_v9 = vadd.f32 %v457_v2, %v88_v3  ;;  %v21_v14 = vld [vmem:[%s1160_s0 + $0x20] sm:$0xff]  ;;  %v160_v15 = vadd.f32 %v457_v2, %v89_v6  ;;  %v161_v21 = vadd.f32 %v457_v2, %v90_v11  ;;  %v162_v22 = vadd.f32 %v457_v2, %v91_v13  ;;  %v24_v25 = vld [vmem:[%s1160_s0 + $0x38] sm:$0xff]  ;;  %v228_v28 = vld [vmem:[%s1163_s3 + $0x28] sm:$0xff] }
   0x6   :  { %v92_v17 = vmul.f32 %v452_v1, %v21_v14  ;;  %v227_v23 = vld [vmem:[%s1163_s3 + $0x20] sm:$0xff]  ;;  %v93_v24 = vmul.f32 %v452_v1, %v22_v18  ;;  %v94_v29 = vmul.f32 %v452_v1, %v23_v19  ;;  %v95_v30 = vmul.f32 %v452_v1, %v24_v25  ;;  %v26_v32 = vld [vmem:[%s1160_s0 + $0x48] sm:$0xff]  ;;  %v229_v36 = vld [vmem:[%s1163_s3 + $0x30] sm:$0xff] }
   0x7   :  { %v287_v20 = vadd.f32 %v223_v5, %v159_v9  ;;  %v288_v26 = vadd.f32 %v224_v10, %v160_v15  ;;  %v25_v31 = vld [vmem:[%s1160_s0 + $0x40] sm:$0xff]  ;;  %v289_v33 = vadd.f32 %v225_v12, %v161_v21  ;;  %v290_v34 = vadd.f32 %v226_v16, %v162_v22  ;;  %v230_v37 = vld [vmem:[%s1163_s3 + $0x38] sm:$0xff]  ;;  %v27_v39 = vld [vmem:[%s1160_s0 + $0x50] sm:$0xff] }
   0x8   :  { %v163_v27 = vadd.f32 %v457_v2, %v92_v17  ;;  %v164_v35 = vadd.f32 %v457_v2, %v93_v24  ;;  %v96_v38 = vmul.f32 %v452_v1, %v25_v31  ;;  %v165_v41 = vadd.f32 %v457_v2, %v94_v29  ;;  %v231_v43 = vld [vmem:[%s1163_s3 + $0x40] sm:$0xff]  ;;  %v28_v45 = vld [vmem:[%s1160_s0 + $0x58] sm:$0xff]  ;;  %v232_v49 = vld [vmem:[%s1163_s3 + $0x48] sm:$0xff] }
   0x9   :  { %351 = vst [vmem:[%s1164_s4] sm:$0xff] %v287_v20  ;;  %352 = vst [vmem:[%s1164_s4 + $0x8] sm:$0xff] %v288_v26  ;;  %v166_v42 = vadd.f32 %v457_v2, %v95_v30  ;;  %v97_v44 = vmul.f32 %v452_v1, %v26_v32  ;;  %v29_v46 = vld [vmem:[%s1160_s0 + $0x60] sm:$0xff]  ;;  %v98_v50 = vmul.f32 %v452_v1, %v27_v39  ;;  %v233_v51 = vld [vmem:[%s1163_s3 + $0x50] sm:$0xff] }
   0xa   :  { %v291_v40 = vadd.f32 %v227_v23, %v163_v27  ;;  %353 = vst [vmem:[%s1164_s4 + $0x10] sm:$0xff] %v289_v33  ;;  %354 = vst [vmem:[%s1164_s4 + $0x18] sm:$0xff] %v290_v34  ;;  %v292_v47 = vadd.f32 %v228_v28, %v164_v35  ;;  %v167_v48 = vadd.f32 %v457_v2, %v96_v38  ;;  %v30_v53 = vld [vmem:[%s1160_s0 + $0x68] sm:$0xff]  ;;  %v234_v57 = vld [vmem:[%s1163_s3 + $0x58] sm:$0xff] }
   0xb   :  { %v99_v52 = vmul.f32 %v452_v1, %v28_v45  ;;  %v293_v54 = vadd.f32 %v229_v36, %v165_v41  ;;  %v294_v55 = vadd.f32 %v230_v37, %v166_v42  ;;  %v168_v56 = vadd.f32 %v457_v2, %v97_v44  ;;  %v31_v59 = vld [vmem:[%s1160_s0 + $0x70] sm:$0xff]  ;;  %v32_v60 = vld [vmem:[%s1160_s0 + $0x78] sm:$0xff]  ;;  %v235_v0 = vld [vmem:[%s1163_s3 + $0x60] sm:$0xff] }
   0xc   :  { %355 = vst [vmem:[%s1164_s4 + $0x20] sm:$0xff] %v291_v40  ;;  %v100_v58 = vmul.f32 %v452_v1, %v29_v46  ;;  %356 = vst [vmem:[%s1164_s4 + $0x28] sm:$0xff] %v292_v47  ;;  %v295_v61 = vadd.f32 %v231_v43, %v167_v48  ;;  %v169_v62 = vadd.f32 %v457_v2, %v98_v50  ;;  %v33_v4 = vld [vmem:[%s1160_s0 + $0x80] sm:$0xff]  ;;  %v236_v7 = vld [vmem:[%s1163_s3 + $0x68] sm:$0xff] }
   0xd   :  { %v170_v63 = vadd.f32 %v457_v2, %v99_v52  ;;  %v101_v3 = vmul.f32 %v452_v1, %v30_v53  ;;  %357 = vst [vmem:[%s1164_s4 + $0x30] sm:$0xff] %v293_v54  ;;  %358 = vst [vmem:[%s1164_s4 + $0x38] sm:$0xff] %v294_v55  ;;  %v296_v5 = vadd.f32 %v232_v49, %v168_v56  ;;  %v34_v10 = vld [vmem:[%s1160_s0 + $0x88] sm:$0xff]  ;;  %v35_v11 = vld [vmem:[%s1160_s0 + $0x90] sm:$0xff] }
   0xe   :  { %v171_v6 = vadd.f32 %v457_v2, %v100_v58  ;;  %v102_v8 = vmul.f32 %v452_v1, %v31_v59  ;;  %v103_v9 = vmul.f32 %v452_v1, %v32_v60  ;;  %359 = vst [vmem:[%s1164_s4 + $0x40] sm:$0xff] %v295_v61  ;;  %v297_v12 = vadd.f32 %v233_v51, %v169_v62  ;;  %v237_v15 = vld [vmem:[%s1163_s3 + $0x70] sm:$0xff]  ;;  %v238_v16 = vld [vmem:[%s1163_s3 + $0x78] sm:$0xff]  ;;  %v239_v22 = vld [vmem:[%s1163_s3 + $0x80] sm:$0xff] }
   0xf   :  { %v298_v13 = vadd.f32 %v234_v57, %v170_v63  ;;  %v172_v14 = vadd.f32 %v457_v2, %v101_v3  ;;  %v104_v17 = vmul.f32 %v452_v1, %v33_v4  ;;  %v36_v18 = vld [vmem:[%s1160_s0 + $0x98] sm:$0xff]  ;;  %360 = vst [vmem:[%s1164_s4 + $0x48] sm:$0xff] %v296_v5  ;;  %v105_v23 = vmul.f32 %v452_v1, %v34_v10  ;;  %v37_v24 = vld [vmem:[%s1160_s0 + $0xa0] sm:$0xff]  ;;  %v38_v25 = vld [vmem:[%s1160_s0 + $0xa8] sm:$0xff] }
  0x10   :  { %v299_v19 = vadd.f32 %v235_v0, %v171_v6  ;;  %v173_v20 = vadd.f32 %v457_v2, %v102_v8  ;;  %v174_v21 = vadd.f32 %v457_v2, %v103_v9  ;;  %361 = vst [vmem:[%s1164_s4 + $0x50] sm:$0xff] %v297_v12  ;;  %v240_v28 = vld [vmem:[%s1163_s3 + $0x88] sm:$0xff]  ;;  %v106_v29 = vmul.f32 %v452_v1, %v35_v11  ;;  %v241_v30 = vld [vmem:[%s1163_s3 + $0x90] sm:$0xff]  ;;  %v242_v36 = vld [vmem:[%s1163_s3 + $0x98] sm:$0xff] }
  0x11   :  { %362 = vst [vmem:[%s1164_s4 + $0x58] sm:$0xff] %v298_v13  ;;  %v300_v26 = vadd.f32 %v236_v7, %v172_v14  ;;  %v175_v27 = vadd.f32 %v457_v2, %v104_v17  ;;  %v107_v31 = vmul.f32 %v452_v1, %v36_v18  ;;  %v39_v32 = vld [vmem:[%s1160_s0 + $0xb0] sm:$0xff]  ;;  %v176_v35 = vadd.f32 %v457_v2, %v105_v23  ;;  %v40_v38 = vld [vmem:[%s1160_s0 + $0xb8] sm:$0xff]  ;;  %v41_v39 = vld [vmem:[%s1160_s0 + $0xc0] sm:$0xff] }
  0x12   :  { %363 = vst [vmem:[%s1164_s4 + $0x60] sm:$0xff] %v299_v19  ;;  %v301_v33 = vadd.f32 %v237_v15, %v173_v20  ;;  %v302_v34 = vadd.f32 %v238_v16, %v174_v21  ;;  %v108_v37 = vmul.f32 %v452_v1, %v37_v24  ;;  %v177_v41 = vadd.f32 %v457_v2, %v106_v29  ;;  %v243_v43 = vld [vmem:[%s1163_s3 + $0xa0] sm:$0xff]  ;;  %v42_v45 = vld [vmem:[%s1160_s0 + $0xc8] sm:$0xff]  ;;  %v43_v51 = vld [vmem:[%s1160_s0 + $0xd0] sm:$0xff] }
  0x13   :  { %364 = vst [vmem:[%s1164_s4 + $0x68] sm:$0xff] %v300_v26  ;;  %v303_v40 = vadd.f32 %v239_v22, %v175_v27  ;;  %v178_v42 = vadd.f32 %v457_v2, %v107_v31  ;;  %v109_v44 = vmul.f32 %v452_v1, %v38_v25  ;;  %v304_v46 = vadd.f32 %v240_v28, %v176_v35  ;;  %v244_v48 = vld [vmem:[%s1163_s3 + $0xa8] sm:$0xff]  ;;  %v44_v52 = vld [vmem:[%s1160_s0 + $0xd8] sm:$0xff]  ;;  %v245_v56 = vld [vmem:[%s1163_s3 + $0xb0] sm:$0xff] }
  0x14   :  { %365 = vst [vmem:[%s1164_s4 + $0x70] sm:$0xff] %v301_v33  ;;  %366 = vst [vmem:[%s1164_s4 + $0x78] sm:$0xff] %v302_v34  ;;  %v179_v47 = vadd.f32 %v457_v2, %v108_v37  ;;  %v110_v49 = vmul.f32 %v452_v1, %v39_v32  ;;  %v111_v50 = vmul.f32 %v452_v1, %v40_v38  ;;  %v246_v57 = vld [vmem:[%s1163_s3 + $0xb8] sm:$0xff]  ;;  %v45_v59 = vld [vmem:[%s1160_s0 + $0xe0] sm:$0xff] }
  0x15   :  { %367 = vst [vmem:[%s1164_s4 + $0x80] sm:$0xff] %v303_v40  ;;  %v305_v53 = vadd.f32 %v241_v30, %v177_v41  ;;  %v306_v54 = vadd.f32 %v242_v36, %v178_v42  ;;  %v180_v55 = vadd.f32 %v457_v2, %v109_v44  ;;  %v112_v58 = vmul.f32 %v452_v1, %v41_v39  ;;  %v247_v63 = vld [vmem:[%s1163_s3 + $0xc0] sm:$0xff]  ;;  %v46_v3 = vld [vmem:[%s1160_s0 + $0xe8] sm:$0xff]  ;;  %v47_v9 = vld [vmem:[%s1160_s0 + $0xf0] sm:$0xff] }
  0x16   :  { %368 = vst [vmem:[%s1164_s4 + $0x88] sm:$0xff] %v304_v46  ;;  %v307_v60 = vadd.f32 %v243_v43, %v179_v47  ;;  %v181_v61 = vadd.f32 %v457_v2, %v110_v49  ;;  %v182_v62 = vadd.f32 %v457_v2, %v111_v50  ;;  %v113_v0 = vmul.f32 %v452_v1, %v42_v45  ;;  %v248_v6 = vld [vmem:[%s1163_s3 + $0xc8] sm:$0xff]  ;;  %v48_v10 = vld [vmem:[%s1160_s0 + $0xf8] sm:$0xff]  ;;  %v249_v14 = vld [vmem:[%s1163_s3 + $0xd0] sm:$0xff] }
  0x17   :  { %369 = vst [vmem:[%s1164_s4 + $0x90] sm:$0xff] %v305_v53  ;;  %370 = vst [vmem:[%s1164_s4 + $0x98] sm:$0xff] %v306_v54  ;;  %v308_v4 = vadd.f32 %v244_v48, %v180_v55  ;;  %v183_v5 = vadd.f32 %v457_v2, %v112_v58  ;;  %v114_v7 = vmul.f32 %v452_v1, %v43_v51  ;;  %v250_v15 = vld [vmem:[%s1163_s3 + $0xd8] sm:$0xff]  ;;  %v49_v17 = vld [vmem:[%s1160_s0 + $0x100] sm:$0xff] }
  0x18   :  { %v115_v8 = vmul.f32 %v452_v1, %v44_v52  ;;  %371 = vst [vmem:[%s1164_s4 + $0xa0] sm:$0xff] %v307_v60  ;;  %v309_v11 = vadd.f32 %v245_v56, %v181_v61  ;;  %v310_v12 = vadd.f32 %v246_v57, %v182_v62  ;;  %v184_v13 = vadd.f32 %v457_v2, %v113_v0  ;;  %v251_v21 = vld [vmem:[%s1163_s3 + $0xe0] sm:$0xff]  ;;  %v50_v23 = vld [vmem:[%s1160_s0 + $0x108] sm:$0xff]  ;;  %v51_v29 = vld [vmem:[%s1160_s0 + $0x110] sm:$0xff] }
  0x19   :  { %v116_v16 = vmul.f32 %v452_v1, %v45_v59  ;;  %372 = vst [vmem:[%s1164_s4 + $0xa8] sm:$0xff] %v308_v4  ;;  %v311_v18 = vadd.f32 %v247_v63, %v183_v5  ;;  %v185_v19 = vadd.f32 %v457_v2, %v114_v7  ;;  %v117_v22 = vmul.f32 %v452_v1, %v46_v3  ;;  %v252_v26 = vld [vmem:[%s1163_s3 + $0xe8] sm:$0xff]  ;;  %v52_v30 = vld [vmem:[%s1160_s0 + $0x118] sm:$0xff]  ;;  %v253_v34 = vld [vmem:[%s1163_s3 + $0xf0] sm:$0xff] }
  0x1a   :  { %v186_v20 = vadd.f32 %v457_v2, %v115_v8  ;;  %373 = vst [vmem:[%s1164_s4 + $0xb0] sm:$0xff] %v309_v11  ;;  %374 = vst [vmem:[%s1164_s4 + $0xb8] sm:$0xff] %v310_v12  ;;  %v312_v24 = vadd.f32 %v248_v6, %v184_v13  ;;  %v118_v27 = vmul.f32 %v452_v1, %v47_v9  ;;  %v254_v35 = vld [vmem:[%s1163_s3 + $0xf8] sm:$0xff]  ;;  %v53_v37 = vld [vmem:[%s1160_s0 + $0x120] sm:$0xff] }
  0x1b   :  { %v187_v25 = vadd.f32 %v457_v2, %v116_v16  ;;  %v119_v28 = vmul.f32 %v452_v1, %v48_v10  ;;  %375 = vst [vmem:[%s1164_s4 + $0xc0] sm:$0xff] %v311_v18  ;;  %v313_v31 = vadd.f32 %v249_v14, %v185_v19  ;;  %v188_v33 = vadd.f32 %v457_v2, %v117_v22  ;;  %v255_v41 = vld [vmem:[%s1163_s3 + $0x100] sm:$0xff]  ;;  %v54_v43 = vld [vmem:[%s1160_s0 + $0x128] sm:$0xff]  ;;  %v55_v49 = vld [vmem:[%s1160_s0 + $0x130] sm:$0xff] }
  0x1c   :  { %v314_v32 = vadd.f32 %v250_v15, %v186_v20  ;;  %v120_v36 = vmul.f32 %v452_v1, %v49_v17  ;;  %376 = vst [vmem:[%s1164_s4 + $0xc8] sm:$0xff] %v312_v24  ;;  %v189_v39 = vadd.f32 %v457_v2, %v118_v27  ;;  %v121_v42 = vmul.f32 %v452_v1, %v50_v23  ;;  %v256_v46 = vld [vmem:[%s1163_s3 + $0x108] sm:$0xff]  ;;  %v56_v50 = vld [vmem:[%s1160_s0 + $0x138] sm:$0xff]  ;;  %v257_v54 = vld [vmem:[%s1163_s3 + $0x110] sm:$0xff] }
  0x1d   :  { %v315_v38 = vadd.f32 %v251_v21, %v187_v25  ;;  %v190_v40 = vadd.f32 %v457_v2, %v119_v28  ;;  %377 = vst [vmem:[%s1164_s4 + $0xd0] sm:$0xff] %v313_v31  ;;  %v316_v44 = vadd.f32 %v252_v26, %v188_v33  ;;  %v122_v47 = vmul.f32 %v452_v1, %v51_v29  ;;  %v258_v55 = vld [vmem:[%s1163_s3 + $0x118] sm:$0xff]  ;;  %v57_v57 = vld [vmem:[%s1160_s0 + $0x140] sm:$0xff]  ;;  %v58_v63 = vld [vmem:[%s1160_s0 + $0x148] sm:$0xff] }
  0x1e   :  { %378 = vst [vmem:[%s1164_s4 + $0xd8] sm:$0xff] %v314_v32  ;;  %v191_v45 = vadd.f32 %v457_v2, %v120_v36  ;;  %v123_v48 = vmul.f32 %v452_v1, %v52_v30  ;;  %v317_v51 = vadd.f32 %v253_v34, %v189_v39  ;;  %v192_v53 = vadd.f32 %v457_v2, %v121_v42  ;;  %v259_v61 = vld [vmem:[%s1163_s3 + $0x120] sm:$0xff]  ;;  %v260_v4 = vld [vmem:[%s1163_s3 + $0x128] sm:$0xff]  ;;  %v59_v7 = vld [vmem:[%s1160_s0 + $0x150] sm:$0xff] }
  0x1f   :  { %379 = vst [vmem:[%s1164_s4 + $0xe0] sm:$0xff] %v315_v38  ;;  %v318_v52 = vadd.f32 %v254_v35, %v190_v40  ;;  %v124_v56 = vmul.f32 %v452_v1, %v53_v37  ;;  %380 = vst [vmem:[%s1164_s4 + $0xe8] sm:$0xff] %v316_v44  ;;  %v193_v59 = vadd.f32 %v457_v2, %v122_v47  ;;  %v60_v8 = vld [vmem:[%s1160_s0 + $0x158] sm:$0xff]  ;;  %v261_v12 = vld [vmem:[%s1163_s3 + $0x130] sm:$0xff] }
  0x20   :  { %v319_v58 = vadd.f32 %v255_v41, %v191_v45  ;;  %v194_v60 = vadd.f32 %v457_v2, %v123_v48  ;;  %v125_v62 = vmul.f32 %v452_v1, %v54_v43  ;;  %381 = vst [vmem:[%s1164_s4 + $0xf0] sm:$0xff] %v317_v51  ;;  %v320_v0 = vadd.f32 %v256_v46, %v192_v53  ;;  %v262_v13 = vld [vmem:[%s1163_s3 + $0x138] sm:$0xff]  ;;  %v61_v15 = vld [vmem:[%s1160_s0 + $0x160] sm:$0xff]  ;;  %v62_v21 = vld [vmem:[%s1160_s0 + $0x168] sm:$0xff] }
  0x21   :  { %382 = vst [vmem:[%s1164_s4 + $0xf8] sm:$0xff] %v318_v52  ;;  %v195_v3 = vadd.f32 %v457_v2, %v124_v56  ;;  %v126_v5 = vmul.f32 %v452_v1, %v55_v49  ;;  %v127_v6 = vmul.f32 %v452_v1, %v56_v50  ;;  %v321_v9 = vadd.f32 %v257_v54, %v193_v59  ;;  %v263_v19 = vld [vmem:[%s1163_s3 + $0x140] sm:$0xff]  ;;  %v264_v24 = vld [vmem:[%s1163_s3 + $0x148] sm:$0xff]  ;;  %v63_v27 = vld [vmem:[%s1160_s0 + $0x170] sm:$0xff] }
  0x22   :  { %383 = vst [vmem:[%s1164_s4 + $0x100] sm:$0xff] %v319_v58  ;;  %v322_v10 = vadd.f32 %v258_v55, %v194_v60  ;;  %v196_v11 = vadd.f32 %v457_v2, %v125_v62  ;;  %v128_v14 = vmul.f32 %v452_v1, %v57_v57  ;;  %384 = vst [vmem:[%s1164_s4 + $0x108] sm:$0xff] %v320_v0  ;;  %v64_v28 = vld [vmem:[%s1160_s0 + $0x178] sm:$0xff]  ;;  %v265_v32 = vld [vmem:[%s1163_s3 + $0x150] sm:$0xff] }
  0x23   :  { %v323_v16 = vadd.f32 %v259_v61, %v195_v3  ;;  %v197_v17 = vadd.f32 %v457_v2, %v126_v5  ;;  %v198_v18 = vadd.f32 %v457_v2, %v127_v6  ;;  %v129_v20 = vmul.f32 %v452_v1, %v58_v63  ;;  %385 = vst [vmem:[%s1164_s4 + $0x110] sm:$0xff] %v321_v9  ;;  %v266_v33 = vld [vmem:[%s1163_s3 + $0x158] sm:$0xff]  ;;  %v65_v35 = vld [vmem:[%s1160_s0 + $0x180] sm:$0xff]  ;;  %v66_v41 = vld [vmem:[%s1160_s0 + $0x188] sm:$0xff] }
  0x24   :  { %386 = vst [vmem:[%s1164_s4 + $0x118] sm:$0xff] %v322_v10  ;;  %v324_v22 = vadd.f32 %v260_v4, %v196_v11  ;;  %v199_v23 = vadd.f32 %v457_v2, %v128_v14  ;;  %v130_v25 = vmul.f32 %v452_v1, %v59_v7  ;;  %v131_v26 = vmul.f32 %v452_v1, %v60_v8  ;;  %v267_v39 = vld [vmem:[%s1163_s3 + $0x160] sm:$0xff]  ;;  %v268_v44 = vld [vmem:[%s1163_s3 + $0x168] sm:$0xff]  ;;  %v67_v47 = vld [vmem:[%s1160_s0 + $0x190] sm:$0xff] }
  0x25   :  { %387 = vst [vmem:[%s1164_s4 + $0x120] sm:$0xff] %v323_v16  ;;  %v325_v29 = vadd.f32 %v261_v12, %v197_v17  ;;  %v326_v30 = vadd.f32 %v262_v13, %v198_v18  ;;  %v200_v31 = vadd.f32 %v457_v2, %v129_v20  ;;  %v132_v34 = vmul.f32 %v452_v1, %v61_v15  ;;  %v68_v48 = vld [vmem:[%s1160_s0 + $0x198] sm:$0xff]  ;;  %v269_v52 = vld [vmem:[%s1163_s3 + $0x170] sm:$0xff]  ;;  %v69_v55 = vld [vmem:[%s1160_s0 + $0x1a0] sm:$0xff] }
  0x26   :  { %388 = vst [vmem:[%s1164_s4 + $0x128] sm:$0xff] %v324_v22  ;;  %v327_v36 = vadd.f32 %v263_v19, %v199_v23  ;;  %v201_v37 = vadd.f32 %v457_v2, %v130_v25  ;;  %v202_v38 = vadd.f32 %v457_v2, %v131_v26  ;;  %v133_v40 = vmul.f32 %v452_v1, %v62_v21  ;;  %v270_v53 = vld [vmem:[%s1163_s3 + $0x178] sm:$0xff]  ;;  %v271_v59 = vld [vmem:[%s1163_s3 + $0x180] sm:$0xff]  ;;  %v70_v61 = vld [vmem:[%s1160_s0 + $0x1a8] sm:$0xff] }
  0x27   :  { %389 = vst [vmem:[%s1164_s4 + $0x130] sm:$0xff] %v325_v29  ;;  %390 = vst [vmem:[%s1164_s4 + $0x138] sm:$0xff] %v326_v30  ;;  %v328_v42 = vadd.f32 %v264_v24, %v200_v31  ;;  %v203_v43 = vadd.f32 %v457_v2, %v132_v34  ;;  %v134_v45 = vmul.f32 %v452_v1, %v63_v27  ;;  %v272_v0 = vld [vmem:[%s1163_s3 + $0x188] sm:$0xff]  ;;  %v71_v5 = vld [vmem:[%s1160_s0 + $0x1b0] sm:$0xff] }
  0x28   :  { %v135_v46 = vmul.f32 %v452_v1, %v64_v28  ;;  %391 = vst [vmem:[%s1164_s4 + $0x140] sm:$0xff] %v327_v36  ;;  %v329_v49 = vadd.f32 %v265_v32, %v201_v37  ;;  %v330_v50 = vadd.f32 %v266_v33, %v202_v38  ;;  %v204_v51 = vadd.f32 %v457_v2, %v133_v40  ;;  %v72_v6 = vld [vmem:[%s1160_s0 + $0x1b8] sm:$0xff]  ;;  %v273_v10 = vld [vmem:[%s1163_s3 + $0x190] sm:$0xff]  ;;  %v73_v13 = vld [vmem:[%s1160_s0 + $0x1c0] sm:$0xff] }
  0x29   :  { %v136_v54 = vmul.f32 %v452_v1, %v65_v35  ;;  %392 = vst [vmem:[%s1164_s4 + $0x148] sm:$0xff] %v328_v42  ;;  %v331_v56 = vadd.f32 %v267_v39, %v203_v43  ;;  %v205_v57 = vadd.f32 %v457_v2, %v134_v45  ;;  %v137_v60 = vmul.f32 %v452_v1, %v66_v41  ;;  %v274_v11 = vld [vmem:[%s1163_s3 + $0x198] sm:$0xff]  ;;  %v275_v17 = vld [vmem:[%s1163_s3 + $0x1a0] sm:$0xff]  ;;  %v74_v19 = vld [vmem:[%s1160_s0 + $0x1c8] sm:$0xff] }
  0x2a   :  { %v206_v58 = vadd.f32 %v457_v2, %v135_v46  ;;  %393 = vst [vmem:[%s1164_s4 + $0x150] sm:$0xff] %v329_v49  ;;  %394 = vst [vmem:[%s1164_s4 + $0x158] sm:$0xff] %v330_v50  ;;  %v332_v62 = vadd.f32 %v268_v44, %v204_v51  ;;  %v138_v3 = vmul.f32 %v452_v1, %v67_v47  ;;  %v276_v22 = vld [vmem:[%s1163_s3 + $0x1a8] sm:$0xff]  ;;  %v75_v25 = vld [vmem:[%s1160_s0 + $0x1d0] sm:$0xff] }
  0x2b   :  { %v207_v63 = vadd.f32 %v457_v2, %v136_v54  ;;  %v139_v4 = vmul.f32 %v452_v1, %v68_v48  ;;  %395 = vst [vmem:[%s1164_s4 + $0x160] sm:$0xff] %v331_v56  ;;  %v333_v7 = vadd.f32 %v269_v52, %v205_v57  ;;  %v208_v9 = vadd.f32 %v457_v2, %v137_v60  ;;  %v76_v26 = vld [vmem:[%s1160_s0 + $0x1d8] sm:$0xff]  ;;  %v277_v30 = vld [vmem:[%s1163_s3 + $0x1b0] sm:$0xff]  ;;  %v77_v33 = vld [vmem:[%s1160_s0 + $0x1e0] sm:$0xff] }
  0x2c   :  { %v334_v8 = vadd.f32 %v270_v53, %v206_v58  ;;  %v140_v12 = vmul.f32 %v452_v1, %v69_v55  ;;  %396 = vst [vmem:[%s1164_s4 + $0x168] sm:$0xff] %v332_v62  ;;  %v209_v15 = vadd.f32 %v457_v2, %v138_v3  ;;  %v141_v18 = vmul.f32 %v452_v1, %v70_v61  ;;  %v278_v31 = vld [vmem:[%s1163_s3 + $0x1b8] sm:$0xff]  ;;  %v279_v37 = vld [vmem:[%s1163_s3 + $0x1c0] sm:$0xff]  ;;  %v78_v39 = vld [vmem:[%s1160_s0 + $0x1e8] sm:$0xff] }
  0x2d   :  { %v335_v14 = vadd.f32 %v271_v59, %v207_v63  ;;  %v210_v16 = vadd.f32 %v457_v2, %v139_v4  ;;  %397 = vst [vmem:[%s1164_s4 + $0x170] sm:$0xff] %v333_v7  ;;  %v336_v20 = vadd.f32 %v272_v0, %v208_v9  ;;  %v142_v23 = vmul.f32 %v452_v1, %v71_v5  ;;  %v280_v42 = vld [vmem:[%s1163_s3 + $0x1c8] sm:$0xff]  ;;  %v79_v45 = vld [vmem:[%s1160_s0 + $0x1f0] sm:$0xff]  ;;  %v80_v46 = vld [vmem:[%s1160_s0 + $0x1f8] sm:$0xff] }
  0x2e   :  { %398 = vst [vmem:[%s1164_s4 + $0x178] sm:$0xff] %v334_v8  ;;  %v211_v21 = vadd.f32 %v457_v2, %v140_v12  ;;  %v143_v24 = vmul.f32 %v452_v1, %v72_v6  ;;  %v337_v27 = vadd.f32 %v273_v10, %v209_v15  ;;  %v212_v29 = vadd.f32 %v457_v2, %v141_v18  ;;  %v281_v50 = vld [vmem:[%s1163_s3 + $0x1d0] sm:$0xff]  ;;  %v282_v51 = vld [vmem:[%s1163_s3 + $0x1d8] sm:$0xff]  ;;  %v283_v56 = vld [vmem:[%s1163_s3 + $0x1e0] sm:$0xff] }
  0x2f   :  { %399 = vst [vmem:[%s1164_s4 + $0x180] sm:$0xff] %v335_v14  ;;  %v338_v28 = vadd.f32 %v274_v11, %v210_v16  ;;  %v144_v32 = vmul.f32 %v452_v1, %v73_v13  ;;  %400 = vst [vmem:[%s1164_s4 + $0x188] sm:$0xff] %v336_v20  ;;  %v213_v35 = vadd.f32 %v457_v2, %v142_v23  ;;  %v284_v60 = vld [vmem:[%s1163_s3 + $0x1e8] sm:$0xff]  ;;  %v285_v4 = vld [vmem:[%s1163_s3 + $0x1f0] sm:$0xff] }
  0x30   :  { %v339_v34 = vadd.f32 %v275_v17, %v211_v21  ;;  %v214_v36 = vadd.f32 %v457_v2, %v143_v24  ;;  %v145_v38 = vmul.f32 %v452_v1, %v74_v19  ;;  %401 = vst [vmem:[%s1164_s4 + $0x190] sm:$0xff] %v337_v27  ;;  %v340_v40 = vadd.f32 %v276_v22, %v212_v29  ;;  %v286_v5 = vld [vmem:[%s1163_s3 + $0x1f8] sm:$0xff] }
  0x31   :  { %402 = vst [vmem:[%s1164_s4 + $0x198] sm:$0xff] %v338_v28  ;;  %v215_v41 = vadd.f32 %v457_v2, %v144_v32  ;;  %v146_v43 = vmul.f32 %v452_v1, %v75_v25  ;;  %v147_v44 = vmul.f32 %v452_v1, %v76_v26  ;;  %v341_v47 = vadd.f32 %v277_v30, %v213_v35 }
  0x32   :  { %403 = vst [vmem:[%s1164_s4 + $0x1a0] sm:$0xff] %v339_v34  ;;  %v342_v48 = vadd.f32 %v278_v31, %v214_v36  ;;  %v216_v49 = vadd.f32 %v457_v2, %v145_v38  ;;  %v148_v52 = vmul.f32 %v452_v1, %v77_v33  ;;  %404 = vst [vmem:[%s1164_s4 + $0x1a8] sm:$0xff] %v340_v40 }
  0x33   :  { %v343_v53 = vadd.f32 %v279_v37, %v215_v41  ;;  %v217_v54 = vadd.f32 %v457_v2, %v146_v43  ;;  %v218_v55 = vadd.f32 %v457_v2, %v147_v44  ;;  %v149_v57 = vmul.f32 %v452_v1, %v78_v39  ;;  %405 = vst [vmem:[%s1164_s4 + $0x1b0] sm:$0xff] %v341_v47 }
  0x34   :  { %406 = vst [vmem:[%s1164_s4 + $0x1b8] sm:$0xff] %v342_v48  ;;  %v344_v58 = vadd.f32 %v280_v42, %v216_v49  ;;  %v219_v59 = vadd.f32 %v457_v2, %v148_v52  ;;  %v150_v61 = vmul.f32 %v452_v1, %v79_v45  ;;  %v151_v62 = vmul.f32 %v452_v1, %v80_v46 }
  0x35   :  { %407 = vst [vmem:[%s1164_s4 + $0x1c0] sm:$0xff] %v343_v53  ;;  %v345_v63 = vadd.f32 %v281_v50, %v217_v54  ;;  %v346_v0 = vadd.f32 %v282_v51, %v218_v55  ;;  %v220_v3 = vadd.f32 %v457_v2, %v149_v57 }
  0x36   :  { %408 = vst [vmem:[%s1164_s4 + $0x1c8] sm:$0xff] %v344_v58  ;;  %v347_v1 = vadd.f32 %v283_v56, %v219_v59  ;;  %v221_v6 = vadd.f32 %v457_v2, %v150_v61  ;;  %v222_v7 = vadd.f32 %v457_v2, %v151_v62 }
  0x37   :  { %409 = vst [vmem:[%s1164_s4 + $0x1d0] sm:$0xff] %v345_v63  ;;  %410 = vst [vmem:[%s1164_s4 + $0x1d8] sm:$0xff] %v346_v0  ;;  %v348_v8 = vadd.f32 %v284_v60, %v220_v3 }
  0x38   :  { %411 = vst [vmem:[%s1164_s4 + $0x1e0] sm:$0xff] %v347_v1  ;;  %v349_v9 = vadd.f32 %v285_v4, %v221_v6  ;;  %v350_v10 = vadd.f32 %v286_v5, %v222_v7 }
  0x39   :  { %412 = vst [vmem:[%s1164_s4 + $0x1e8] sm:$0xff] %v348_v8 }
  0x3a   :  { %413 = vst [vmem:[%s1164_s4 + $0x1f0] sm:$0xff] %v349_v9  ;;  %414 = vst [vmem:[%s1164_s4 + $0x1f8] sm:$0xff] %v350_v10 }

</bundles_post_ra>
